<compile_context>
chip_gen: v7x
topology: tpu7x:2x2x1
jax: 0.10.0
libtpu: 0.0.40
codegen_flags: <defaults>
</compile_context>

<pallas_src>
import functools

import jax
import jax.numpy as jnp
from jax import lax
from jax.experimental import pallas as pl
from jax.experimental.pallas import tpu as pltpu

_EPS = 1e-5
_NEG = -1e30

# param_list layout (indices):
#  0 ln1_g  1 ln1_b  2 Wq  3 Wk  4 Wv  5 Wo  6 bo  7 ln2_g  8 ln2_b
#  9 Wr  10 br  11 W1[E,C,H]  12 b1[E,1,H]  13 W2[E,H,C]  14 b2[E,1,C]
_BF16_IDX = (2, 3, 4, 5, 9, 11, 13)   # matmul weights fed to the MXU as bf16


def _cast_weights(param_list):
    return [p.astype(jnp.bfloat16) if i in _BF16_IDX else p
            for i, p in enumerate(param_list)]


def _layernorm(v, g, b):
    mu = jnp.mean(v, axis=-1, keepdims=True)
    var = jnp.mean(jnp.square(v - mu), axis=-1, keepdims=True)
    return (v - mu) * lax.rsqrt(var + _EPS) * g + b


def _attention_and_router(x, ln1g, ln1b, wq, wk, wv, wo, bo, ln2g, ln2b, wr, br,
                          *, n_head, head_size, num_experts, top_k, use_approx_recip):
    """f32 (T, C) -> (x1, h2_bf16, gates).  Weight matrices are expected in bf16.
    Shared between the Pallas kernel (use_approx_recip=True) and the reference."""
    T, C = x.shape
    hs = head_size

    # --- x1 = x + SA(LN1(x)) ------------------------------------------------------------
    h = _layernorm(x, ln1g, ln1b).astype(jnp.bfloat16)          # bf16 MXU operand
    q = jnp.dot(h, wq, preferred_element_type=jnp.float32)      # (T, C) f32
    k = jnp.dot(h, wk, preferred_element_type=jnp.float32)
    v = jnp.dot(h, wv, preferred_element_type=jnp.float32)

    # heads batched: (n_head, T, hs) built from static lane slices (no reshape/3-D transpose)
    q3 = jnp.stack([q[:, i * hs:(i + 1) * hs] for i in range(n_head)], axis=0).astype(jnp.bfloat16)
    k3 = jnp.stack([k[:, i * hs:(i + 1) * hs] for i in range(n_head)], axis=0).astype(jnp.bfloat16)
    v3 = jnp.stack([v[:, i * hs:(i + 1) * hs] for i in range(n_head)], axis=0).astype(jnp.bfloat16)

    scale = float(hs) ** -0.5
    s = jnp.einsum('htd,hsd->hts', q3, k3,
                   preferred_element_type=jnp.float32) * scale            # (nh, T, T) f32
    row = lax.broadcasted_iota(jnp.int32, (T, T), 0)
    col = lax.broadcasted_iota(jnp.int32, (T, T), 1)
    s = jnp.where(col <= row, s, _NEG)                                    # causal mask (f32)
    s = s - jnp.max(s, axis=-1, keepdims=True)
    p = jnp.exp(s)
    denom = jnp.sum(p, axis=-1, keepdims=True)
    if use_approx_recip:
        p = p * pl.reciprocal(denom, approx=True)
    else:
        p = p / denom
    o3 = jnp.einsum('hts,hsd->htd', p.astype(jnp.bfloat16), v3,
                    preferred_element_type=jnp.float32)                   # (nh, T, hs) f32

    # concat heads -> single wide (T, C) @ (C, C) output projection
    o_cat = jnp.concatenate([o3[i] for i in range(n_head)], axis=-1).astype(jnp.bfloat16)
    att = jnp.dot(o_cat, wo, preferred_element_type=jnp.float32) + bo
    x1 = x + att

    # --- router / gates on LN2(x1) --------------------------------------------------------
    h2 = _layernorm(x1, ln2g, ln2b)
    h2b = h2.astype(jnp.bfloat16)
    n_opts = num_experts + 1
    logits = jnp.dot(h2b, wr, preferred_element_type=jnp.float32) + br    # (T, E+1) f32

    # iterative top-k (small k), ties broken toward lowest index; f32 throughout
    opt_idx = lax.broadcasted_iota(jnp.int32, (T, n_opts), 1)
    masked = logits
    sel = jnp.zeros((T, n_opts), jnp.int32)
    for _ in range(top_k):
        m = jnp.max(masked, axis=-1, keepdims=True)
        is_max = masked >= m
        first = jnp.min(jnp.where(is_max, opt_idx, n_opts), axis=-1, keepdims=True)
        pick = opt_idx == first
        sel = jnp.maximum(sel, pick.astype(jnp.int32))
        masked = jnp.where(pick, _NEG, masked)

    gl = jnp.where(sel > 0, logits, _NEG)
    gl = gl - jnp.max(gl, axis=-1, keepdims=True)
    ge = jnp.exp(gl)                                    # unselected slots are exactly 0
    gsum = jnp.sum(ge, axis=-1, keepdims=True)
    if use_approx_recip:
        gates = ge * pl.reciprocal(gsum, approx=True)
    else:
        gates = ge / gsum
    return x1, h2b, gates


def _expert_ffn(h2b, w1e, b1e, w2e, b2e):
    """One expert FFN: (T,C) bf16 -> (T,C) f32; weights bf16, biases f32."""
    hid = jnp.maximum(jnp.dot(h2b, w1e, preferred_element_type=jnp.float32) + b1e, 0.0)
    return jnp.dot(hid.astype(jnp.bfloat16), w2e, preferred_element_type=jnp.float32) + b2e


def _kernel(x_ref, ln1g, ln1b, wq, wk, wv, wo, bo, ln2g, ln2b, wr, br,
            w1, b1, w2, b2, o_ref, acc_s, h2_s, gates_s,
            *, n_head, head_size, num_experts, top_k):
    e = pl.program_id(1)              # expert grid index (last axis, "arbitrary")
    T, C = acc_s.shape

    # Attention + router once per batch element; stash residual / LN2 activations / gates.
    @pl.when(e == 0)
    def _():
        x1, h2b, gates = _attention_and_router(
            x_ref[...].astype(jnp.float32),
            ln1g[...], ln1b[...], wq[...], wk[...], wv[...], wo[...], bo[...],
            ln2g[...], ln2b[...], wr[...], br[...],
            n_head=n_head, head_size=head_size, num_experts=num_experts,
            top_k=top_k, use_approx_recip=True)
        acc_s[...] = x1               # accumulator starts at the residual x1
        h2_s[...] = h2b
        gates_s[...] = gates

    # Expert `e` (its W1/b1/W2/b2 block is the only expert resident in VMEM this step).
    # TODO(synk): pl.when(token_count[e] > 0) via scalar prefetch to exploit routing sparsity.
    ye = _expert_ffn(h2_s[...], w1[...], b1[...], w2[...], b2[...])
    n_opts = num_experts + 1
    opt_idx = lax.broadcasted_iota(jnp.int32, (T, n_opts), 1)
    gate_e = jnp.sum(jnp.where(opt_idx == e, gates_s[...], 0.0), axis=-1, keepdims=True)
    acc_s[...] = acc_s[...] + gate_e * ye   # skip slot (index num_experts) never matches -> 0

    @pl.when(e == num_experts - 1)
    def _():
        o_ref[...] = acc_s[...].astype(o_ref.dtype)


def skip_layer_decoder_block(x, param_list, *, n_head, head_size, num_experts, top_k):
    B, T, C = x.shape
    params = _cast_weights(param_list)   # one-time bf16 cast of MXU weights (outside the kernel)
    kernel = functools.partial(_kernel, n_head=n_head, head_size=head_size,
                               num_experts=num_experts, top_k=top_k)

    def const_spec(a):
        nd = a.ndim
        return pl.BlockSpec(a.shape, lambda b, e, _nd=nd: (0,) * _nd)

    def expert_spec(a):
        nd = a.ndim
        return pl.BlockSpec((None,) + a.shape[1:],
                            lambda b, e, _nd=nd: (e,) + (0,) * (_nd - 1))

    in_specs = [pl.BlockSpec((None, T, C), lambda b, e: (b, 0, 0))]          # x (batch squeezed)
    in_specs += [const_spec(p) for p in params[:11]]                         # shared weights
    in_specs += [expert_spec(p) for p in params[11:]]                        # per-expert weights

    grid_spec = pltpu.PrefetchScalarGridSpec(
        num_scalar_prefetch=0,
        grid=(B, num_experts),                       # expert (reduction) axis last
        in_specs=in_specs,
        out_specs=pl.BlockSpec((None, T, C), lambda b, e: (b, 0, 0)),
        scratch_shapes=[
            pltpu.VMEM((T, C), jnp.float32),                 # acc: x1 + sum_e gate_e * ye
            pltpu.VMEM((T, C), jnp.bfloat16),                # LN2 activations (MXU operand)
            pltpu.VMEM((T, num_experts + 1), jnp.float32),   # gates
        ],
    )
    return pl.pallas_call(
        kernel,
        out_shape=jax.ShapeDtypeStruct((B, T, C), x.dtype),
        grid_spec=grid_spec,
        compiler_params=pltpu.CompilerParams(
            dimension_semantics=("parallel", "arbitrary"),
            # safe on v5e/v6e/v7x; size to actual buffer usage at production shapes
            vmem_limit_bytes=32 * 1024 * 1024,
        ),
    )(x, *params)


def _ref_block(x, ln1g, ln1b, wq, wk, wv, wo, bo, ln2g, ln2b, wr, br, w1, b1, w2, b2,
               *, n_head, head_size, num_experts, top_k):
    """Pure-jnp single-batch reference (same bf16-operand math, exact reciprocals)."""
    x1, h2b, gates = _attention_and_router(
        x, ln1g, ln1b, wq, wk, wv, wo, bo, ln2g, ln2b, wr, br,
        n_head=n_head, head_size=head_size, num_experts=num_experts,
        top_k=top_k, use_approx_recip=False)
    out = x1
    for e in range(num_experts):
        ye = _expert_ffn(h2b, w1[e], b1[e], w2[e], b2[e])
        out = out + gates[:, e:e + 1] * ye
    return out


def _init_params(key, n_embed, num_experts):
    C = n_embed
    H = 4 * C
    E = num_experts
    ks = jax.random.split(key, 10)
    w = lambda k, shape: (0.02 * jax.random.normal(k, shape, jnp.float32))
    return [
        jnp.ones((1, C), jnp.float32),            # ln1 gamma
        jnp.zeros((1, C), jnp.float32),           # ln1 beta
        w(ks[0], (C, C)),                         # Wq (heads concatenated)
        w(ks[1], (C, C)),                         # Wk
        w(ks[2], (C, C)),                         # Wv
        w(ks[3], (C, C)),                         # Wo (output projection)
        w(ks[4], (1, C)),                         # bo
        jnp.ones((1, C), jnp.float32),            # ln2 gamma
        jnp.zeros((1, C), jnp.float32),           # ln2 beta
        w(ks[5], (C, E + 1)),                     # router weight (last slot = skip)
        w(ks[6], (1, E + 1)),                     # router bias
        w(ks[7], (E, C, H)),                      # expert W1
        jnp.zeros((E, 1, H), jnp.float32),        # expert b1
        w(ks[8], (E, H, C)),                      # expert W2
        jnp.zeros((E, 1, C), jnp.float32),        # expert b2
    ]


if __name__ == "__main__":
    B, T = 2, 8
    n_embed, n_head, num_experts, top_k = 32, 4, 4, 2
    head_size = n_embed // n_head

    key = jax.random.PRNGKey(0)
    kx, kp = jax.random.split(key)
    x = jax.random.normal(kx, (B, T, n_embed), jnp.float32)
    params = _init_params(kp, n_embed, num_experts)

    out = skip_layer_decoder_block(x, params, n_head=n_head, head_size=head_size,
                                   num_experts=num_experts, top_k=top_k)
    out = jax.block_until_ready(out)

    cast = _cast_weights(params)
    ref_fn = functools.partial(_ref_block, n_head=n_head, head_size=head_size,
                               num_experts=num_experts, top_k=top_k)
    ref = jax.vmap(lambda xb: ref_fn(xb, *cast))(x)
    ref = jax.block_until_ready(ref)

    assert out.shape == (B, T, n_embed)
    assert bool(jnp.all(jnp.isfinite(out)))
    assert bool(jnp.allclose(out, ref, atol=2e-2, rtol=2e-2))
    print("KERNEL_OK")
</pallas_src>

<mosaic_0001>
module attributes {stable_mosaic.version = 11 : i64} {
  func.func @_kernel(%arg0: i32, %arg1: i32, %arg2: memref<1x8x32xf32, #tpu.memory_space<vmem>>, %arg3: memref<1x32xf32, #tpu.memory_space<vmem>>, %arg4: memref<1x32xf32, #tpu.memory_space<vmem>>, %arg5: memref<32x32xbf16, #tpu.memory_space<vmem>>, %arg6: memref<32x32xbf16, #tpu.memory_space<vmem>>, %arg7: memref<32x32xbf16, #tpu.memory_space<vmem>>, %arg8: memref<32x32xbf16, #tpu.memory_space<vmem>>, %arg9: memref<1x32xf32, #tpu.memory_space<vmem>>, %arg10: memref<1x32xf32, #tpu.memory_space<vmem>>, %arg11: memref<1x32xf32, #tpu.memory_space<vmem>>, %arg12: memref<32x5xbf16, #tpu.memory_space<vmem>>, %arg13: memref<1x5xf32, #tpu.memory_space<vmem>>, %arg14: memref<1x32x128xbf16, #tpu.memory_space<vmem>>, %arg15: memref<1x1x128xf32, #tpu.memory_space<vmem>>, %arg16: memref<1x128x32xbf16, #tpu.memory_space<vmem>>, %arg17: memref<1x1x32xf32, #tpu.memory_space<vmem>>, %arg18: memref<1x8x32xf32, #tpu.memory_space<vmem>>, %arg19: memref<8x32xf32, #tpu.memory_space<vmem>>, %arg20: memref<8x32xbf16, #tpu.memory_space<vmem>>, %arg21: memref<8x5xf32, #tpu.memory_space<vmem>>) attributes {dimension_semantics = [#tpu.dimension_semantics<parallel>, #tpu.dimension_semantics<arbitrary>], iteration_bounds = array<i64: 2, 4>, scalar_prefetch = 0 : i64, scratch_operands = 3 : i64, tpu.core_type = #tpu.core_type<tc>, window_params = [{transform_indices = @transform_0, window_bounds = array<i64: 1, 8, 32>}, {pipeline_mode = #tpu.pipeline_mode<synchronous>, transform_indices = @transform_1, window_bounds = array<i64: 1, 32>}, {pipeline_mode = #tpu.pipeline_mode<synchronous>, transform_indices = @transform_2, window_bounds = array<i64: 1, 32>}, {pipeline_mode = #tpu.pipeline_mode<synchronous>, transform_indices = @transform_3, window_bounds = array<i64: 32, 32>}, {pipeline_mode = #tpu.pipeline_mode<synchronous>, transform_indices = @transform_4, window_bounds = array<i64: 32, 32>}, {pipeline_mode = #tpu.pipeline_mode<synchronous>, transform_indices = @transform_5, window_bounds = array<i64: 32, 32>}, {pipeline_mode = #tpu.pipeline_mode<synchronous>, transform_indices = @transform_6, window_bounds = array<i64: 32, 32>}, {pipeline_mode = #tpu.pipeline_mode<synchronous>, transform_indices = @transform_7, window_bounds = array<i64: 1, 32>}, {pipeline_mode = #tpu.pipeline_mode<synchronous>, transform_indices = @transform_8, window_bounds = array<i64: 1, 32>}, {pipeline_mode = #tpu.pipeline_mode<synchronous>, transform_indices = @transform_9, window_bounds = array<i64: 1, 32>}, {pipeline_mode = #tpu.pipeline_mode<synchronous>, transform_indices = @transform_10, window_bounds = array<i64: 32, 5>}, {pipeline_mode = #tpu.pipeline_mode<synchronous>, transform_indices = @transform_11, window_bounds = array<i64: 1, 5>}, {transform_indices = @transform_12, window_bounds = array<i64: 1, 32, 128>}, {transform_indices = @transform_13, window_bounds = array<i64: 1, 1, 128>}, {transform_indices = @transform_14, window_bounds = array<i64: 1, 128, 32>}, {transform_indices = @transform_15, window_bounds = array<i64: 1, 1, 32>}, {transform_indices = @transform_16, window_bounds = array<i64: 1, 8, 32>}]} {
    %c0_i32 = arith.constant 0 : i32
    %0 = arith.cmpi eq, %arg1, %c0_i32 : i32
    %1 = arith.extui %0 : i1 to i32
    %c0_i32_0 = arith.constant 0 : i32
    %2 = arith.cmpi ne, %1, %c0_i32_0 : i32
    scf.if %2 {
      %c0_25 = arith.constant 0 : index
      %c0_26 = arith.constant 0 : index
      %c0_27 = arith.constant 0 : index
      %37 = vector.load %arg2[%c0_25, %c0_26, %c0_27] : memref<1x8x32xf32, #tpu.memory_space<vmem>>, vector<1x8x32xf32>
      %38 = vector.shape_cast %37 : vector<1x8x32xf32> to vector<8x32xf32>
      %c0_28 = arith.constant 0 : index
      %c0_29 = arith.constant 0 : index
      %39 = vector.load %arg3[%c0_28, %c0_29] : memref<1x32xf32, #tpu.memory_space<vmem>>, vector<1x32xf32>
      %c0_30 = arith.constant 0 : index
      %c0_31 = arith.constant 0 : index
      %40 = vector.load %arg4[%c0_30, %c0_31] : memref<1x32xf32, #tpu.memory_space<vmem>>, vector<1x32xf32>
      %c0_32 = arith.constant 0 : index
      %c0_33 = arith.constant 0 : index
      %41 = vector.load %arg5[%c0_32, %c0_33] : memref<32x32xbf16, #tpu.memory_space<vmem>>, vector<32x32xbf16>
      %c0_34 = arith.constant 0 : index
      %c0_35 = arith.constant 0 : index
      %42 = vector.load %arg6[%c0_34, %c0_35] : memref<32x32xbf16, #tpu.memory_space<vmem>>, vector<32x32xbf16>
      %c0_36 = arith.constant 0 : index
      %c0_37 = arith.constant 0 : index
      %43 = vector.load %arg7[%c0_36, %c0_37] : memref<32x32xbf16, #tpu.memory_space<vmem>>, vector<32x32xbf16>
      %c0_38 = arith.constant 0 : index
      %c0_39 = arith.constant 0 : index
      %44 = vector.load %arg8[%c0_38, %c0_39] : memref<32x32xbf16, #tpu.memory_space<vmem>>, vector<32x32xbf16>
      %c0_40 = arith.constant 0 : index
      %c0_41 = arith.constant 0 : index
      %45 = vector.load %arg9[%c0_40, %c0_41] : memref<1x32xf32, #tpu.memory_space<vmem>>, vector<1x32xf32>
      %c0_42 = arith.constant 0 : index
      %c0_43 = arith.constant 0 : index
      %46 = vector.load %arg10[%c0_42, %c0_43] : memref<1x32xf32, #tpu.memory_space<vmem>>, vector<1x32xf32>
      %c0_44 = arith.constant 0 : index
      %c0_45 = arith.constant 0 : index
      %47 = vector.load %arg11[%c0_44, %c0_45] : memref<1x32xf32, #tpu.memory_space<vmem>>, vector<1x32xf32>
      %c0_46 = arith.constant 0 : index
      %c0_47 = arith.constant 0 : index
      %48 = vector.load %arg12[%c0_46, %c0_47] : memref<32x5xbf16, #tpu.memory_space<vmem>>, vector<32x5xbf16>
      %c0_48 = arith.constant 0 : index
      %c0_49 = arith.constant 0 : index
      %49 = vector.load %arg13[%c0_48, %c0_49] : memref<1x5xf32, #tpu.memory_space<vmem>>, vector<1x5xf32>
      %cst_50 = arith.constant dense<0.000000e+00> : vector<8xf32>
      %50 = vector.multi_reduction <add>, %38, %cst_50 [1] : vector<8x32xf32> to vector<8xf32>
      %51 = vector.shape_cast %50 : vector<8xf32> to vector<8x1xf32>
      %cst_51 = arith.constant 3.200000e+01 : f32
      %52 = vector.broadcast %cst_51 : f32 to vector<8x1xf32>
      %53 = arith.divf %51, %52 : vector<8x1xf32>
      %54 = vector.broadcast %53 : vector<8x1xf32> to vector<8x32xf32>
      %55 = arith.subf %38, %54 : vector<8x32xf32>
      %56 = arith.mulf %55, %55 : vector<8x32xf32>
      %cst_52 = arith.constant dense<0.000000e+00> : vector<8xf32>
      %57 = vector.multi_reduction <add>, %56, %cst_52 [1] : vector<8x32xf32> to vector<8xf32>
      %58 = vector.shape_cast %57 : vector<8xf32> to vector<8x1xf32>
      %cst_53 = arith.constant 3.200000e+01 : f32
      %59 = vector.broadcast %cst_53 : f32 to vector<8x1xf32>
      %60 = arith.divf %58, %59 : vector<8x1xf32>
      %61 = vector.broadcast %53 : vector<8x1xf32> to vector<8x32xf32>
      %62 = arith.subf %38, %61 : vector<8x32xf32>
      %cst_54 = arith.constant 9.99999974E-6 : f32
      %63 = vector.broadcast %cst_54 : f32 to vector<8x1xf32>
      %64 = arith.addf %60, %63 : vector<8x1xf32>
      %65 = math.rsqrt %64 : vector<8x1xf32>
      %66 = vector.broadcast %65 : vector<8x1xf32> to vector<8x32xf32>
      %67 = arith.mulf %62, %66 : vector<8x32xf32>
      %68 = vector.broadcast %39 : vector<1x32xf32> to vector<8x32xf32>
      %69 = arith.mulf %67, %68 : vector<8x32xf32>
      %70 = vector.broadcast %40 : vector<1x32xf32> to vector<8x32xf32>
      %71 = arith.addf %69, %70 : vector<8x32xf32>
      %72 = arith.truncf %71 : vector<8x32xf32> to vector<8x32xbf16>
      %cst_55 = arith.constant dense<0.000000e+00> : vector<8x32xf32>
      %73 = tpu.matmul %72, %41, %cst_55 {dimension_numbers = #tpu.dot_dimension_numbers<[1], [0], [0], [1], [0, 0, 1, 1], [], []>} : vector<8x32xbf16>, vector<32x32xbf16>, vector<8x32xf32> -> vector<8x32xf32>
      %cst_56 = arith.constant dense<0.000000e+00> : vector<8x32xf32>
      %74 = tpu.matmul %72, %42, %cst_56 {dimension_numbers = #tpu.dot_dimension_numbers<[1], [0], [0], [1], [0, 0, 1, 1], [], []>} : vector<8x32xbf16>, vector<32x32xbf16>, vector<8x32xf32> -> vector<8x32xf32>
      %cst_57 = arith.constant dense<0.000000e+00> : vector<8x32xf32>
      %75 = tpu.matmul %72, %43, %cst_57 {dimension_numbers = #tpu.dot_dimension_numbers<[1], [0], [0], [1], [0, 0, 1, 1], [], []>} : vector<8x32xbf16>, vector<32x32xbf16>, vector<8x32xf32> -> vector<8x32xf32>
      %76 = vector.extract_strided_slice %73 {offsets = [0, 0], sizes = [8, 8], strides = [1, 1]} : vector<8x32xf32> to vector<8x8xf32>
      %77 = vector.extract_strided_slice %73 {offsets = [0, 8], sizes = [8, 8], strides = [1, 1]} : vector<8x32xf32> to vector<8x8xf32>
      %78 = vector.extract_strided_slice %73 {offsets = [0, 16], sizes = [8, 8], strides = [1, 1]} : vector<8x32xf32> to vector<8x8xf32>
      %79 = vector.extract_strided_slice %73 {offsets = [0, 24], sizes = [8, 8], strides = [1, 1]} : vector<8x32xf32> to vector<8x8xf32>
      %80 = vector.shape_cast %76 : vector<8x8xf32> to vector<1x8x8xf32>
      %81 = vector.shape_cast %77 : vector<8x8xf32> to vector<1x8x8xf32>
      %82 = vector.shape_cast %78 : vector<8x8xf32> to vector<1x8x8xf32>
      %83 = vector.shape_cast %79 : vector<8x8xf32> to vector<1x8x8xf32>
      %84 = tpu.concatenate %80, %81, %82, %83 in 0 : vector<1x8x8xf32>, vector<1x8x8xf32>, vector<1x8x8xf32>, vector<1x8x8xf32> -> vector<4x8x8xf32>
      %85 = arith.truncf %84 : vector<4x8x8xf32> to vector<4x8x8xbf16>
      %86 = vector.extract_strided_slice %74 {offsets = [0, 0], sizes = [8, 8], strides = [1, 1]} : vector<8x32xf32> to vector<8x8xf32>
      %87 = vector.extract_strided_slice %74 {offsets = [0, 8], sizes = [8, 8], strides = [1, 1]} : vector<8x32xf32> to vector<8x8xf32>
      %88 = vector.extract_strided_slice %74 {offsets = [0, 16], sizes = [8, 8], strides = [1, 1]} : vector<8x32xf32> to vector<8x8xf32>
      %89 = vector.extract_strided_slice %74 {offsets = [0, 24], sizes = [8, 8], strides = [1, 1]} : vector<8x32xf32> to vector<8x8xf32>
      %90 = vector.shape_cast %86 : vector<8x8xf32> to vector<1x8x8xf32>
      %91 = vector.shape_cast %87 : vector<8x8xf32> to vector<1x8x8xf32>
      %92 = vector.shape_cast %88 : vector<8x8xf32> to vector<1x8x8xf32>
      %93 = vector.shape_cast %89 : vector<8x8xf32> to vector<1x8x8xf32>
      %94 = tpu.concatenate %90, %91, %92, %93 in 0 : vector<1x8x8xf32>, vector<1x8x8xf32>, vector<1x8x8xf32>, vector<1x8x8xf32> -> vector<4x8x8xf32>
      %95 = arith.truncf %94 : vector<4x8x8xf32> to vector<4x8x8xbf16>
      %96 = vector.extract_strided_slice %75 {offsets = [0, 0], sizes = [8, 8], strides = [1, 1]} : vector<8x32xf32> to vector<8x8xf32>
      %97 = vector.extract_strided_slice %75 {offsets = [0, 8], sizes = [8, 8], strides = [1, 1]} : vector<8x32xf32> to vector<8x8xf32>
      %98 = vector.extract_strided_slice %75 {offsets = [0, 16], sizes = [8, 8], strides = [1, 1]} : vector<8x32xf32> to vector<8x8xf32>
      %99 = vector.extract_strided_slice %75 {offsets = [0, 24], sizes = [8, 8], strides = [1, 1]} : vector<8x32xf32> to vector<8x8xf32>
      %100 = vector.shape_cast %96 : vector<8x8xf32> to vector<1x8x8xf32>
      %101 = vector.shape_cast %97 : vector<8x8xf32> to vector<1x8x8xf32>
      %102 = vector.shape_cast %98 : vector<8x8xf32> to vector<1x8x8xf32>
      %103 = vector.shape_cast %99 : vector<8x8xf32> to vector<1x8x8xf32>
      %104 = tpu.concatenate %100, %101, %102, %103 in 0 : vector<1x8x8xf32>, vector<1x8x8xf32>, vector<1x8x8xf32>, vector<1x8x8xf32> -> vector<4x8x8xf32>
      %105 = arith.truncf %104 : vector<4x8x8xf32> to vector<4x8x8xbf16>
      "tpu.trace_start"() <{level = 10 : i32, message = "htd,hsd->hts"}> : () -> ()
      %cst_58 = arith.constant dense<0.000000e+00> : vector<4x8x8xf32>
      %106 = tpu.matmul %85, %95, %cst_58 {dimension_numbers = #tpu.dot_dimension_numbers<[2], [2], [1], [1], [0, 0, 0, 1, 1, 1], [0], [0]>} : vector<4x8x8xbf16>, vector<4x8x8xbf16>, vector<4x8x8xf32> -> vector<4x8x8xf32>
      "tpu.trace_stop"() : () -> ()
      %cst_59 = arith.constant 0.353553385 : f32
      %107 = vector.broadcast %cst_59 : f32 to vector<4x8x8xf32>
      %108 = arith.mulf %106, %107 : vector<4x8x8xf32>
      %109 = tpu.iota {dimensions = array<i32: 0>} : vector<8x8xi32>
      %110 = tpu.iota {dimensions = array<i32: 1>} : vector<8x8xi32>
      %111 = arith.cmpi sle, %110, %109 : vector<8x8xi32>
      %cst_60 = arith.constant -1.000000e+30 : f32
      %112 = vector.shape_cast %111 : vector<8x8xi1> to vector<1x8x8xi1>
      %113 = vector.broadcast %112 : vector<1x8x8xi1> to vector<4x8x8xi1>
      %114 = vector.broadcast %cst_60 : f32 to vector<4x8x8xf32>
      %115 = arith.select %113, %108, %114 : vector<4x8x8xi1>, vector<4x8x8xf32>
      %cst_61 = arith.constant dense<0xFF800000> : vector<4x8xf32>
      %116 = vector.multi_reduction <maximumf>, %115, %cst_61 [2] : vector<4x8x8xf32> to vector<4x8xf32>
      %117 = vector.shape_cast %116 : vector<4x8xf32> to vector<4x8x1xf32>
      %118 = vector.broadcast %117 : vector<4x8x1xf32> to vector<4x8x8xf32>
      %119 = arith.subf %115, %118 : vector<4x8x8xf32>
      %120 = math.exp %119 : vector<4x8x8xf32>
      %cst_62 = arith.constant dense<0.000000e+00> : vector<4x8xf32>
      %121 = vector.multi_reduction <add>, %120, %cst_62 [2] : vector<4x8x8xf32> to vector<4x8xf32>
      %122 = vector.shape_cast %121 : vector<4x8xf32> to vector<4x8x1xf32>
      %123 = tpu.reciprocal %122 {approx = true} : vector<4x8x1xf32> -> vector<4x8x1xf32>
      %124 = vector.broadcast %123 : vector<4x8x1xf32> to vector<4x8x8xf32>
      %125 = arith.mulf %120, %124 : vector<4x8x8xf32>
      %126 = arith.truncf %125 : vector<4x8x8xf32> to vector<4x8x8xbf16>
      "tpu.trace_start"() <{level = 10 : i32, message = "hts,hsd->htd"}> : () -> ()
      %cst_63 = arith.constant dense<0.000000e+00> : vector<4x8x8xf32>
      %127 = tpu.matmul %126, %105, %cst_63 {dimension_numbers = #tpu.dot_dimension_numbers<[2], [1], [1], [2], [0, 0, 0, 1, 1, 2], [0], [0]>} : vector<4x8x8xbf16>, vector<4x8x8xbf16>, vector<4x8x8xf32> -> vector<4x8x8xf32>
      "tpu.trace_stop"() : () -> ()
      %128 = vector.extract_strided_slice %127 {offsets = [0, 0, 0], sizes = [1, 8, 8], strides = [1, 1, 1]} : vector<4x8x8xf32> to vector<1x8x8xf32>
      %129 = vector.shape_cast %128 : vector<1x8x8xf32> to vector<8x8xf32>
      %130 = vector.extract_strided_slice %127 {offsets = [1, 0, 0], sizes = [1, 8, 8], strides = [1, 1, 1]} : vector<4x8x8xf32> to vector<1x8x8xf32>
      %131 = vector.shape_cast %130 : vector<1x8x8xf32> to vector<8x8xf32>
      %132 = vector.extract_strided_slice %127 {offsets = [2, 0, 0], sizes = [1, 8, 8], strides = [1, 1, 1]} : vector<4x8x8xf32> to vector<1x8x8xf32>
      %133 = vector.shape_cast %132 : vector<1x8x8xf32> to vector<8x8xf32>
      %134 = vector.extract_strided_slice %127 {offsets = [3, 0, 0], sizes = [1, 8, 8], strides = [1, 1, 1]} : vector<4x8x8xf32> to vector<1x8x8xf32>
      %135 = vector.shape_cast %134 : vector<1x8x8xf32> to vector<8x8xf32>
      %136 = tpu.concatenate %129, %131, %133, %135 in 1 : vector<8x8xf32>, vector<8x8xf32>, vector<8x8xf32>, vector<8x8xf32> -> vector<8x32xf32>
      %137 = arith.truncf %136 : vector<8x32xf32> to vector<8x32xbf16>
      %cst_64 = arith.constant dense<0.000000e+00> : vector<8x32xf32>
      %138 = tpu.matmul %137, %44, %cst_64 {dimension_numbers = #tpu.dot_dimension_numbers<[1], [0], [0], [1], [0, 0, 1, 1], [], []>} : vector<8x32xbf16>, vector<32x32xbf16>, vector<8x32xf32> -> vector<8x32xf32>
      %139 = vector.broadcast %45 : vector<1x32xf32> to vector<8x32xf32>
      %140 = arith.addf %138, %139 : vector<8x32xf32>
      %141 = arith.addf %38, %140 : vector<8x32xf32>
      %cst_65 = arith.constant dense<0.000000e+00> : vector<8xf32>
      %142 = vector.multi_reduction <add>, %141, %cst_65 [1] : vector<8x32xf32> to vector<8xf32>
      %143 = vector.shape_cast %142 : vector<8xf32> to vector<8x1xf32>
      %cst_66 = arith.constant 3.200000e+01 : f32
      %144 = vector.broadcast %cst_66 : f32 to vector<8x1xf32>
      %145 = arith.divf %143, %144 : vector<8x1xf32>
      %146 = vector.broadcast %145 : vector<8x1xf32> to vector<8x32xf32>
      %147 = arith.subf %141, %146 : vector<8x32xf32>
      %148 = arith.mulf %147, %147 : vector<8x32xf32>
      %cst_67 = arith.constant dense<0.000000e+00> : vector<8xf32>
      %149 = vector.multi_reduction <add>, %148, %cst_67 [1] : vector<8x32xf32> to vector<8xf32>
      %150 = vector.shape_cast %149 : vector<8xf32> to vector<8x1xf32>
      %cst_68 = arith.constant 3.200000e+01 : f32
      %151 = vector.broadcast %cst_68 : f32 to vector<8x1xf32>
      %152 = arith.divf %150, %151 : vector<8x1xf32>
      %153 = vector.broadcast %145 : vector<8x1xf32> to vector<8x32xf32>
      %154 = arith.subf %141, %153 : vector<8x32xf32>
      %cst_69 = arith.constant 9.99999974E-6 : f32
      %155 = vector.broadcast %cst_69 : f32 to vector<8x1xf32>
      %156 = arith.addf %152, %155 : vector<8x1xf32>
      %157 = math.rsqrt %156 : vector<8x1xf32>
      %158 = vector.broadcast %157 : vector<8x1xf32> to vector<8x32xf32>
      %159 = arith.mulf %154, %158 : vector<8x32xf32>
      %160 = vector.broadcast %46 : vector<1x32xf32> to vector<8x32xf32>
      %161 = arith.mulf %159, %160 : vector<8x32xf32>
      %162 = vector.broadcast %47 : vector<1x32xf32> to vector<8x32xf32>
      %163 = arith.addf %161, %162 : vector<8x32xf32>
      %164 = arith.truncf %163 : vector<8x32xf32> to vector<8x32xbf16>
      %cst_70 = arith.constant dense<0.000000e+00> : vector<8x5xf32>
      %165 = tpu.matmul %164, %48, %cst_70 {dimension_numbers = #tpu.dot_dimension_numbers<[1], [0], [0], [1], [0, 0, 1, 1], [], []>} : vector<8x32xbf16>, vector<32x5xbf16>, vector<8x5xf32> -> vector<8x5xf32>
      %166 = vector.broadcast %49 : vector<1x5xf32> to vector<8x5xf32>
      %167 = arith.addf %165, %166 : vector<8x5xf32>
      %168 = tpu.iota {dimensions = array<i32: 1>} : vector<8x5xi32>
      %c0_i32_71 = arith.constant 0 : i32
      %169 = vector.broadcast %c0_i32_71 : i32 to vector<8x5xi32>
      %cst_72 = arith.constant dense<0xFF800000> : vector<8xf32>
      %170 = vector.multi_reduction <maximumf>, %167, %cst_72 [1] : vector<8x5xf32> to vector<8xf32>
      %171 = vector.shape_cast %170 : vector<8xf32> to vector<8x1xf32>
      %172 = vector.broadcast %171 : vector<8x1xf32> to vector<8x5xf32>
      %173 = arith.cmpf oge, %167, %172 : vector<8x5xf32>
      %c5_i32 = arith.constant 5 : i32
      %174 = vector.broadcast %c5_i32 : i32 to vector<8x5xi32>
      %175 = arith.select %173, %168, %174 : vector<8x5xi1>, vector<8x5xi32>
      %cst_73 = arith.constant dense<2147483647> : vector<8xi32>
      %176 = vector.multi_reduction <minsi>, %175, %cst_73 [1] : vector<8x5xi32> to vector<8xi32>
      %177 = vector.shape_cast %176 : vector<8xi32> to vector<8x1xi32>
      %178 = vector.broadcast %177 : vector<8x1xi32> to vector<8x5xi32>
      %179 = arith.cmpi eq, %168, %178 : vector<8x5xi32>
      %180 = arith.extui %179 : vector<8x5xi1> to vector<8x5xi32>
      %181 = arith.maxsi %169, %180 : vector<8x5xi32>
      %cst_74 = arith.constant -1.000000e+30 : f32
      %182 = vector.broadcast %cst_74 : f32 to vector<8x5xf32>
      %183 = arith.select %179, %182, %167 : vector<8x5xi1>, vector<8x5xf32>
      %cst_75 = arith.constant dense<0xFF800000> : vector<8xf32>
      %184 = vector.multi_reduction <maximumf>, %183, %cst_75 [1] : vector<8x5xf32> to vector<8xf32>
      %185 = vector.shape_cast %184 : vector<8xf32> to vector<8x1xf32>
      %186 = vector.broadcast %185 : vector<8x1xf32> to vector<8x5xf32>
      %187 = arith.cmpf oge, %183, %186 : vector<8x5xf32>
      %c5_i32_76 = arith.constant 5 : i32
      %188 = vector.broadcast %c5_i32_76 : i32 to vector<8x5xi32>
      %189 = arith.select %187, %168, %188 : vector<8x5xi1>, vector<8x5xi32>
      %cst_77 = arith.constant dense<2147483647> : vector<8xi32>
      %190 = vector.multi_reduction <minsi>, %189, %cst_77 [1] : vector<8x5xi32> to vector<8xi32>
      %191 = vector.shape_cast %190 : vector<8xi32> to vector<8x1xi32>
      %192 = vector.broadcast %191 : vector<8x1xi32> to vector<8x5xi32>
      %193 = arith.cmpi eq, %168, %192 : vector<8x5xi32>
      %194 = arith.extui %193 : vector<8x5xi1> to vector<8x5xi32>
      %195 = arith.maxsi %181, %194 : vector<8x5xi32>
      %c0_i32_78 = arith.constant 0 : i32
      %196 = vector.broadcast %c0_i32_78 : i32 to vector<8x5xi32>
      %197 = arith.cmpi sgt, %195, %196 : vector<8x5xi32>
      %cst_79 = arith.constant -1.000000e+30 : f32
      %198 = vector.broadcast %cst_79 : f32 to vector<8x5xf32>
      %199 = arith.select %197, %167, %198 : vector<8x5xi1>, vector<8x5xf32>
      %cst_80 = arith.constant dense<0xFF800000> : vector<8xf32>
      %200 = vector.multi_reduction <maximumf>, %199, %cst_80 [1] : vector<8x5xf32> to vector<8xf32>
      %201 = vector.shape_cast %200 : vector<8xf32> to vector<8x1xf32>
      %202 = vector.broadcast %201 : vector<8x1xf32> to vector<8x5xf32>
      %203 = arith.subf %199, %202 : vector<8x5xf32>
      %204 = math.exp %203 : vector<8x5xf32>
      %cst_81 = arith.constant dense<0.000000e+00> : vector<8xf32>
      %205 = vector.multi_reduction <add>, %204, %cst_81 [1] : vector<8x5xf32> to vector<8xf32>
      %206 = vector.shape_cast %205 : vector<8xf32> to vector<8x1xf32>
      %207 = tpu.reciprocal %206 {approx = true} : vector<8x1xf32> -> vector<8x1xf32>
      %208 = vector.broadcast %207 : vector<8x1xf32> to vector<8x5xf32>
      %209 = arith.mulf %204, %208 : vector<8x5xf32>
      %c0_82 = arith.constant 0 : index
      %c0_83 = arith.constant 0 : index
      %210 = vector.load %arg19[%c0_82, %c0_83] : memref<8x32xf32, #tpu.memory_space<vmem>>, vector<8x32xf32>
      tpu.vector_store %arg19[%c0_82, %c0_83], %141 {strides = array<i32>} : memref<8x32xf32, #tpu.memory_space<vmem>>, vector<8x32xf32>,
      %c0_84 = arith.constant 0 : index
      %c0_85 = arith.constant 0 : index
      %211 = vector.load %arg20[%c0_84, %c0_85] : memref<8x32xbf16, #tpu.memory_space<vmem>>, vector<8x32xbf16>
      tpu.vector_store %arg20[%c0_84, %c0_85], %164 {strides = array<i32>} : memref<8x32xbf16, #tpu.memory_space<vmem>>, vector<8x32xbf16>,
      %c0_86 = arith.constant 0 : index
      %c0_87 = arith.constant 0 : index
      %212 = vector.load %arg21[%c0_86, %c0_87] : memref<8x5xf32, #tpu.memory_space<vmem>>, vector<8x5xf32>
      tpu.vector_store %arg21[%c0_86, %c0_87], %209 {strides = array<i32>} : memref<8x5xf32, #tpu.memory_space<vmem>>, vector<8x5xf32>,
    } else {
    }
    %c0 = arith.constant 0 : index
    %c0_1 = arith.constant 0 : index
    %3 = vector.load %arg20[%c0, %c0_1] : memref<8x32xbf16, #tpu.memory_space<vmem>>, vector<8x32xbf16>
    %c0_2 = arith.constant 0 : index
    %c0_3 = arith.constant 0 : index
    %c0_4 = arith.constant 0 : index
    %4 = vector.load %arg14[%c0_2, %c0_3, %c0_4] : memref<1x32x128xbf16, #tpu.memory_space<vmem>>, vector<1x32x128xbf16>
    %5 = vector.shape_cast %4 : vector<1x32x128xbf16> to vector<32x128xbf16>
    %c0_5 = arith.constant 0 : index
    %c0_6 = arith.constant 0 : index
    %c0_7 = arith.constant 0 : index
    %6 = vector.load %arg15[%c0_5, %c0_6, %c0_7] : memref<1x1x128xf32, #tpu.memory_space<vmem>>, vector<1x1x128xf32>
    %7 = vector.shape_cast %6 : vector<1x1x128xf32> to vector<1x128xf32>
    %c0_8 = arith.constant 0 : index
    %c0_9 = arith.constant 0 : index
    %c0_10 = arith.constant 0 : index
    %8 = vector.load %arg16[%c0_8, %c0_9, %c0_10] : memref<1x128x32xbf16, #tpu.memory_space<vmem>>, vector<1x128x32xbf16>
    %9 = vector.shape_cast %8 : vector<1x128x32xbf16> to vector<128x32xbf16>
    %c0_11 = arith.constant 0 : index
    %c0_12 = arith.constant 0 : index
    %c0_13 = arith.constant 0 : index
    %10 = vector.load %arg17[%c0_11, %c0_12, %c0_13] : memref<1x1x32xf32, #tpu.memory_space<vmem>>, vector<1x1x32xf32>
    %11 = vector.shape_cast %10 : vector<1x1x32xf32> to vector<1x32xf32>
    %cst = arith.constant dense<0.000000e+00> : vector<8x128xf32>
    %12 = tpu.matmul %3, %5, %cst {dimension_numbers = #tpu.dot_dimension_numbers<[1], [0], [0], [1], [0, 0, 1, 1], [], []>} : vector<8x32xbf16>, vector<32x128xbf16>, vector<8x128xf32> -> vector<8x128xf32>
    %13 = vector.broadcast %7 : vector<1x128xf32> to vector<8x128xf32>
    %14 = arith.addf %12, %13 : vector<8x128xf32>
    %cst_14 = arith.constant 0.000000e+00 : f32
    %15 = vector.broadcast %cst_14 : f32 to vector<8x128xf32>
    %16 = arith.maximumf %14, %15 : vector<8x128xf32>
    %17 = arith.truncf %16 : vector<8x128xf32> to vector<8x128xbf16>
    %cst_15 = arith.constant dense<0.000000e+00> : vector<8x32xf32>
    %18 = tpu.matmul %17, %9, %cst_15 {dimension_numbers = #tpu.dot_dimension_numbers<[1], [0], [0], [1], [0, 0, 1, 1], [], []>} : vector<8x128xbf16>, vector<128x32xbf16>, vector<8x32xf32> -> vector<8x32xf32>
    %19 = vector.broadcast %11 : vector<1x32xf32> to vector<8x32xf32>
    %20 = arith.addf %18, %19 : vector<8x32xf32>
    %21 = tpu.iota {dimensions = array<i32: 1>} : vector<8x5xi32>
    %22 = vector.broadcast %arg1 : i32 to vector<8x5xi32>
    %23 = arith.cmpi eq, %21, %22 : vector<8x5xi32>
    %c0_16 = arith.constant 0 : index
    %c0_17 = arith.constant 0 : index
    %24 = vector.load %arg21[%c0_16, %c0_17] : memref<8x5xf32, #tpu.memory_space<vmem>>, vector<8x5xf32>
    %cst_18 = arith.constant 0.000000e+00 : f32
    %25 = vector.broadcast %cst_18 : f32 to vector<8x5xf32>
    %26 = arith.select %23, %24, %25 : vector<8x5xi1>, vector<8x5xf32>
    %cst_19 = arith.constant dense<0.000000e+00> : vector<8xf32>
    %27 = vector.multi_reduction <add>, %26, %cst_19 [1] : vector<8x5xf32> to vector<8xf32>
    %28 = vector.shape_cast %27 : vector<8xf32> to vector<8x1xf32>
    %c0_20 = arith.constant 0 : index
    %c0_21 = arith.constant 0 : index
    %29 = vector.load %arg19[%c0_20, %c0_21] : memref<8x32xf32, #tpu.memory_space<vmem>>, vector<8x32xf32>
    %30 = vector.broadcast %28 : vector<8x1xf32> to vector<8x32xf32>
    %31 = arith.mulf %30, %20 : vector<8x32xf32>
    %32 = arith.addf %29, %31 : vector<8x32xf32>
    %c0_22 = arith.constant 0 : index
    %c0_23 = arith.constant 0 : index
    %33 = vector.load %arg19[%c0_22, %c0_23] : memref<8x32xf32, #tpu.memory_space<vmem>>, vector<8x32xf32>
    tpu.vector_store %arg19[%c0_22, %c0_23], %32 {strides = array<i32>} : memref<8x32xf32, #tpu.memory_space<vmem>>, vector<8x32xf32>,
    %c3_i32 = arith.constant 3 : i32
    %34 = arith.cmpi eq, %arg1, %c3_i32 : i32
    %35 = arith.extui %34 : i1 to i32
    %c0_i32_24 = arith.constant 0 : i32
    %36 = arith.cmpi ne, %35, %c0_i32_24 : i32
    scf.if %36 {
      %c0_25 = arith.constant 0 : index
      %c0_26 = arith.constant 0 : index
      %37 = vector.load %arg19[%c0_25, %c0_26] : memref<8x32xf32, #tpu.memory_space<vmem>>, vector<8x32xf32>
      %c0_27 = arith.constant 0 : index
      %c0_28 = arith.constant 0 : index
      %c0_29 = arith.constant 0 : index
      %38 = vector.load %arg18[%c0_27, %c0_28, %c0_29] : memref<1x8x32xf32, #tpu.memory_space<vmem>>, vector<1x8x32xf32>
      %39 = vector.shape_cast %38 : vector<1x8x32xf32> to vector<8x32xf32>
      %40 = vector.shape_cast %37 : vector<8x32xf32> to vector<1x8x32xf32>
      tpu.vector_store %arg18[%c0_27, %c0_28, %c0_29], %40 {strides = array<i32>} : memref<1x8x32xf32, #tpu.memory_space<vmem>>, vector<1x8x32xf32>,
    } else {
    }
    return
  }
  func.func @transform_0(%arg0: i32, %arg1: i32) -> (i32, i32, i32) {
    %c0_i32 = arith.constant 0 : i32
    %c0_i32_0 = arith.constant 0 : i32
    %c0_i32_1 = arith.constant 0 : i32
    return %arg0, %c0_i32, %c0_i32_0 : i32, i32, i32
  }
  func.func @transform_1(%arg0: i32, %arg1: i32) -> (i32, i32) {
    %c0_i32 = arith.constant 0 : i32
    %c0_i32_0 = arith.constant 0 : i32
    %c0_i32_1 = arith.constant 0 : i32
    return %c0_i32, %c0_i32_0 : i32, i32
  }
  func.func @transform_2(%arg0: i32, %arg1: i32) -> (i32, i32) {
    %c0_i32 = arith.constant 0 : i32
    %c0_i32_0 = arith.constant 0 : i32
    %c0_i32_1 = arith.constant 0 : i32
    return %c0_i32, %c0_i32_0 : i32, i32
  }
  func.func @transform_3(%arg0: i32, %arg1: i32) -> (i32, i32) {
    %c0_i32 = arith.constant 0 : i32
    %c0_i32_0 = arith.constant 0 : i32
    %c0_i32_1 = arith.constant 0 : i32
    return %c0_i32, %c0_i32_0 : i32, i32
  }
  func.func @transform_4(%arg0: i32, %arg1: i32) -> (i32, i32) {
    %c0_i32 = arith.constant 0 : i32
    %c0_i32_0 = arith.constant 0 : i32
    %c0_i32_1 = arith.constant 0 : i32
    return %c0_i32, %c0_i32_0 : i32, i32
  }
  func.func @transform_5(%arg0: i32, %arg1: i32) -> (i32, i32) {
    %c0_i32 = arith.constant 0 : i32
    %c0_i32_0 = arith.constant 0 : i32
    %c0_i32_1 = arith.constant 0 : i32
    return %c0_i32, %c0_i32_0 : i32, i32
  }
  func.func @transform_6(%arg0: i32, %arg1: i32) -> (i32, i32) {
    %c0_i32 = arith.constant 0 : i32
    %c0_i32_0 = arith.constant 0 : i32
    %c0_i32_1 = arith.constant 0 : i32
    return %c0_i32, %c0_i32_0 : i32, i32
  }
  func.func @transform_7(%arg0: i32, %arg1: i32) -> (i32, i32) {
    %c0_i32 = arith.constant 0 : i32
    %c0_i32_0 = arith.constant 0 : i32
    %c0_i32_1 = arith.constant 0 : i32
    return %c0_i32, %c0_i32_0 : i32, i32
  }
  func.func @transform_8(%arg0: i32, %arg1: i32) -> (i32, i32) {
    %c0_i32 = arith.constant 0 : i32
    %c0_i32_0 = arith.constant 0 : i32
    %c0_i32_1 = arith.constant 0 : i32
    return %c0_i32, %c0_i32_0 : i32, i32
  }
  func.func @transform_9(%arg0: i32, %arg1: i32) -> (i32, i32) {
    %c0_i32 = arith.constant 0 : i32
    %c0_i32_0 = arith.constant 0 : i32
    %c0_i32_1 = arith.constant 0 : i32
    return %c0_i32, %c0_i32_0 : i32, i32
  }
  func.func @transform_10(%arg0: i32, %arg1: i32) -> (i32, i32) {
    %c0_i32 = arith.constant 0 : i32
    %c0_i32_0 = arith.constant 0 : i32
    %c0_i32_1 = arith.constant 0 : i32
    return %c0_i32, %c0_i32_0 : i32, i32
  }
  func.func @transform_11(%arg0: i32, %arg1: i32) -> (i32, i32) {
    %c0_i32 = arith.constant 0 : i32
    %c0_i32_0 = arith.constant 0 : i32
    %c0_i32_1 = arith.constant 0 : i32
    return %c0_i32, %c0_i32_0 : i32, i32
  }
  func.func @transform_12(%arg0: i32, %arg1: i32) -> (i32, i32, i32) {
    %c0_i32 = arith.constant 0 : i32
    %c0_i32_0 = arith.constant 0 : i32
    %c0_i32_1 = arith.constant 0 : i32
    return %arg1, %c0_i32, %c0_i32_0 : i32, i32, i32
  }
  func.func @transform_13(%arg0: i32, %arg1: i32) -> (i32, i32, i32) {
    %c0_i32 = arith.constant 0 : i32
    %c0_i32_0 = arith.constant 0 : i32
    %c0_i32_1 = arith.constant 0 : i32
    return %arg1, %c0_i32, %c0_i32_0 : i32, i32, i32
  }
  func.func @transform_14(%arg0: i32, %arg1: i32) -> (i32, i32, i32) {
    %c0_i32 = arith.constant 0 : i32
    %c0_i32_0 = arith.constant 0 : i32
    %c0_i32_1 = arith.constant 0 : i32
    return %arg1, %c0_i32, %c0_i32_0 : i32, i32, i32
  }
  func.func @transform_15(%arg0: i32, %arg1: i32) -> (i32, i32, i32) {
    %c0_i32 = arith.constant 0 : i32
    %c0_i32_0 = arith.constant 0 : i32
    %c0_i32_1 = arith.constant 0 : i32
    return %arg1, %c0_i32, %c0_i32_0 : i32, i32, i32
  }
  func.func @transform_16(%arg0: i32, %arg1: i32) -> (i32, i32, i32) {
    %c0_i32 = arith.constant 0 : i32
    %c0_i32_0 = arith.constant 0 : i32
    %c0_i32_1 = arith.constant 0 : i32
    return %arg0, %c0_i32, %c0_i32_0 : i32, i32, i32
  }
}

</mosaic_0001>

<bundles_post_ra>
// kernel: tpu_custom_call.1
= control target key start
LH: loop header
LB: loop body
LE: loop exit
PB: predicated region body
PF: predicated region fallthrough
CT: control target
= control target key end

     0   :  { %s2757_s0 = inlined_call_operand.vmem [shape: f32[2,8,32], index: 0, kind: input, shape index: {}]   ;;  %s2758_s1 = inlined_call_operand.vmem [shape: f32[1,32], index: 1, kind: input, shape index: {}]   ;;  %s2759_s2 = inlined_call_operand.vmem [shape: f32[1,32], index: 2, kind: input, shape index: {}]   ;;  %s2760_s3 = inlined_call_operand.vmem [shape: bf16[32,32], index: 3, kind: input, shape index: {}]   ;;  %s2761_s4 = inlined_call_operand.vmem [shape: bf16[32,32], index: 4, kind: input, shape index: {}]   ;;  %s2762_s5 = inlined_call_operand.vmem [shape: bf16[32,32], index: 5, kind: input, shape index: {}]   ;;  %s2763_s6 = inlined_call_operand.vmem [shape: bf16[32,32], index: 6, kind: input, shape index: {}]   ;;  %s2764_s7 = inlined_call_operand.vmem [shape: f32[1,32], index: 7, kind: input, shape index: {}]   ;;  %s2765_s8 = inlined_call_operand.vmem [shape: f32[1,32], index: 8, kind: input, shape index: {}]   ;;  %s2766_s9 = inlined_call_operand.vmem [shape: f32[1,32], index: 9, kind: input, shape index: {}]   ;;  %s2767_s10 = inlined_call_operand.vmem [shape: bf16[32,5], index: 10, kind: input, shape index: {}]   ;;  %s2768_s11 = inlined_call_operand.vmem [shape: f32[1,5], index: 11, kind: input, shape index: {}]   ;;  %s2769_s12 = inlined_call_operand.vmem [shape: bf16[4,32,128], index: 12, kind: input, shape index: {}]   ;;  %s2770_s13 = inlined_call_operand.vmem [shape: f32[4,1,128], index: 13, kind: input, shape index: {}]   ;;  %s2771_s14 = inlined_call_operand.vmem [shape: bf16[4,128,32], index: 14, kind: input, shape index: {}]   ;;  %s2772_s15 = inlined_call_operand.vmem [shape: f32[4,1,32], index: 15, kind: input, shape index: {}]   ;;  %s2773_s16 = inlined_call_operand.hbm [shape: f32[2,8,32], index: 16, kind: output, shape index: {}]  }
   0x1   :  { %2789 = sst [smem:[#allocation20_spill]] %s2757_s0 }
   0x2   :  { %2790 = sst [smem:[#allocation21_spill]] %s2764_s7 }
   0x3   :  { %2791 = sst [smem:[#allocation22_spill]] %s2765_s8 }
   0x4   :  { %2792 = sst [smem:[#allocation23_spill]] %s2766_s9 }
   0x5   :  { %2793 = sst [smem:[#allocation24_spill]] %s2767_s10 }
   0x6   :  { %2794 = sst [smem:[#allocation25_spill]] %s2768_s11 }
   0x7   :  { %2795 = sst [smem:[#allocation26_spill]] %s2773_s16 }
   0x8   :  { %21 = vsyncpa [#allocation6], 0 }
   0x9   :  { %23 = vsyncpa [#allocation6 + $0x1], 0  ;;  %s2394_s21 = smov 0   ;;  %s2396_s22 = smov 0  }
   0xa   :  { %s2398_s23 = smov 0   ;;  %s2400_s24 = smov 0  }
   0xb   :  { %s2402_s25 = smov 0   ;;  %s2404_s26 = smov 0  }
   0xc   :  { %s2406_s27 = smov 0   ;;  %s2408_s28 = smov 0  }
   0xd LB: > { %2796 = sst [smem:[#allocation8_spill]] %s2267_s21  ;;  %s1855_s29 = sadd.s32 4294967295, %s2295_s28   ;;  %s2295_s28 = sphi %s2408_s28, %s29_s28   ;;  %s2291_s27 = sphi %s2406_s27, %s2831_s27   ;;  %s2287_s26 = sphi %s2404_s26, %s2830_s26   ;;  %s2283_s25 = sphi %s2402_s25, %s2829_s25   ;;  %s2279_s24 = sphi %s2400_s24, %s2828_s24   ;;  %s2275_s23 = sphi %s2398_s23, %s2827_s23   ;;  %s2271_s22 = sphi %s2396_s22, %s2826_s22   ;;  %s2267_s21 = sphi %s2394_s21, %s2825_s21  }
   0xe   : > { %2797 = sst [smem:[#allocation9_spill]] %s2271_s22  ;;  %s1856_s30 = sadd.s32 4294967294, %s2295_s28  }
   0xf   : > { %2798 = sst [smem:[#allocation10_spill]] %s2275_s23  ;;  %s38_s0 = sadd.s32 1, %s2287_s26 }
  0x10   : > { %2799 = sst [smem:[#allocation11_spill]] %s2283_s25  ;;  %p39_p0 = scmp.ge.s32.totalorder %s38_s0, 4 }
  0x11   : > { %2800 = sst [smem:[#allocation12_spill]] %s2287_s26  ;;  %s41_s17 = sadd.s32 1, %s2291_s27 }
  0x12   : > { %2801 = sst [smem:[#allocation13_spill]] %s2291_s27  ;;  %p419_p1 = scmp.ne.s32.totalorder %s2275_s23, %s2271_s22 }
  0x13   : > { %2802 = sst [smem:[#allocation14_spill]] %s2295_s28  ;;  %p420_p2 = scmp.eq.s32.totalorder %s1855_s29, 7 }
  0x14   : > { %s2833_s0 = smov (%p39_p0, %s38_s0), 0  ;;  %s2835_s17 = smov (!%p39_p0, %s41_s17), %s2291_s27 }
  0x15   : > { %2803 = sst [smem:[#allocation15_spill]] %s2833_s0  ;;  %p2443_p3 = por %p420_p2, %p419_p1 }
  0x16   : > { %p425_p4 = scmp.ne.s32.totalorder %s2271_s22, %s2267_s21  ;;  %p43_p5 = scmp.ge.s32.totalorder %s2835_s17, 2 }
  0x17   : > { %s2804_s18 = scalar_select %p2443_p3, 1, 0 }
  0x18   : > { %p426_p6 = scmp.eq.s32.totalorder %s1856_s30, 7  ;;  %p1859_p7 = scmp.ge.s32.totalorder %s2295_s28, 1 }
  0x19   : > { %2805 = sst [smem:[#allocation16_spill]] %s2804_s18  ;;  %p512_p8 = scmp.lt.s32.totalorder %s2295_s28, 9 }
  0x1a   : > { %s2837_s17 = smov (%p43_p5, %s2835_s17), 0  ;;  %p2453_p9 = por %p426_p6, %p425_p4 }
  0x1b   : > { %2806 = sst [smem:[#allocation17_spill]] %s2837_s17  ;;  %p513_p10 = pnand %p1859_p7, %p512_p8 }
  0x1c   : > { %s2807_s19 = scalar_select %p2453_p9, 1, 0 }
  0x1d   : > { %s406_s20 = ssub.s32 %s2291_s27, %s2837_s17  ;;  %s409_s29 = sadd.s32 1, %s2275_s23 }
  0x1e   : > { %2808 = sst [smem:[#allocation18_spill]] %s2807_s19  ;;  %p407_p11 = scmp.eq.s32.totalorder %s406_s20, 0 }
  0x1f   : > { %516 = sbr.rel (%p513_p10) target bundleno = 4037 (0xfc5), region = 84  ;;  %s2783_s30 = sand.u32 (!%p513_p10), 1, %s2271_s22  }
  0x20   : > { %s2461_s0 = scalar_select %p407_p11, %s2275_s23, %s409_s29  }
  0x21   : > { %p577_p12 = scmp.lt.s32.totalorder (!%p513_p10), %s2283_s25, 1  ;;  %s2467_s26 = sshll.u32 (!%p513_p10), %s2783_s30, 3 }
  0x22   : > { %2809 = sst [smem:[#allocation19_spill]] %s2461_s0  ;;  %p581_p13 = scmp.lt.s32.totalorder (!%p513_p10), %s2279_s24, 3 }
  0x23   : > { %s2810_s0 = sld [smem:[#allocation20_spill]] (!%p513_p10)  ;;  %p1866_p0 = scmp.ne.s32.totalorder (!%p513_p10), %s2279_s24, 0 }
  0x26   : > { %s578_s19 = scalar_select %p577_p12, %s2283_s25, 1 }
  0x27   : > { %s2472_s17 = scalar_select %p581_p13, %s2279_s24, 3 }
  0x28   : > { %s1861_s20 = sshll.u32 %s578_s19, 3  ;;  %601 = sbr.rel (%p1866_p0) target bundleno = 3557 (0xde5), region = 88  ;;  %vm629_vm0 = vcmask (!%p1866_p0), 261120   ;;  %v2157_v7 = vld [vmem:[%s2760_s3] sm:$0xff] (!%p1866_p0)   ;;  %v2297_v9 = vmov (!%p1866_p0), 0.0   ;;  %v2159_v10 = vld [vmem:[%s2760_s3 + $0x8] sm:$0xff] (!%p1866_p0)   ;;  %v1049_v56 = vlaneseq (!%p1866_p0) }
  0x29   : > { %s580_s23 = scalar_lea.vmem %s2810_s0, %s1861_s20  ;;  %s1914_s21 = sshll.u32 %s2472_s17, 4  ;;  %v2158_v8 = vld [vmem:[%s2761_s4] sm:$0xff] (!%p1866_p0)   ;;  %1959 = vmatprep.subr.bf16.mxu0 (!%p1866_p0), %v2297_v9  ;;  %1967 = vmatprep.subr.bf16.mxu1 (!%p1866_p0), %v2297_v9  ;;  %v2160_v11 = vld [vmem:[%s2761_s4 + $0x8] sm:$0xff] (!%p1866_p0)   ;;  %vm2298_vm1 = vmmov (!%p1866_p0), 0   ;;  %vm860_vm2 = vcmask (!%p1866_p0), 64512   ;;  %vm1111_vm3 = vcmask (!%p1866_p0), 1043456  }
  0x2a   : > { %s2481_s30 = scalar_lea.vmem %s2769_s12, %s1914_s21  ;;  %s588_s25 = scalar_lea.vmem %s2770_s13, %s2472_s17  ;;  %v2499_v0 = vld [vmem:[%s580_s23] sm:$0xff] (!%p1866_p0)  ;;  %1960 = vmatpush3.bf16.msra.mxu0 (!%p1866_p0), %v2157_v7  ;;  %1968 = vmatpush3.bf16.msra.mxu1 (!%p1866_p0), %v2158_v8  ;;  %v2162_v23 = vld [vmem:[%s2762_s5 + $0x8] sm:$0xff] (!%p1866_p0)   ;;  %v1050_v57 = vshrl.u32 (!%p1866_p0), %v1049_v56, 7  ;;  %v2582_v58 = vand.u32 (!%p1866_p0), 127, %v1049_v56  ;;  %vm1306_vm5 = vcmask (!%p1866_p0), 130048   ;;  %vm1308_vm6 = vcmask (!%p1866_p0), 195584  }
  0x2b   : > { %s1915_s11 = sshll.u32 %s2472_s17, 6  ;;  %s596_s10 = scalar_lea.vmem %s2772_s15, %s2472_s17  ;;  %v630_v1 = vsel (!%p1866_p0), %vm629_vm0, %v2499_v0, 0.0  ;;  %1961 = vmatprep.subr.bf16.mxu0 (!%p1866_p0), %v2297_v9  ;;  %1969 = vmatprep.subr.bf16.mxu1 (!%p1866_p0), %v2297_v9  ;;  %v1867_v16 = vld [vmem:[%s2758_s1] ss:$0 sm:$0xff] (!%p1866_p0)  ;;  %vm1525_vm7 = vcmask (!%p1866_p0), 257024   ;;  %vm1462_vm8 = vcmask (!%p1866_p0), 39936  }
  0x2c   : > { %s2495_s27 = scalar_lea.vmem %s2771_s14, %s1915_s11  ;;  %s576_s0 = scalar_lea.vmem [#allocation5], %s2467_s26  ;;  %631 = vadd.xlane.f32.xlu0 (!%p1866_p0), %v630_v1  ;;  %1963 = vmatprep.mubr.msk.bf16.mxu0 (!%p1866_p0), %vm2298_vm1, %v2297_v9  ;;  %v1868_v18 = vld [vmem:[%s2759_s2] ss:$0 sm:$0xff] (!%p1866_p0)  ;;  %vm1053_vm4 = vcmp.le.s32.totalorder (!%p1866_p0), %v2582_v58, %v1050_v57 }
  0x2d   : > { %1971 = vmatprep.mubr.msk.bf16.mxu1 (!%p1866_p0), %vm2298_vm1, %v2297_v9  ;;  %v2161_v21 = vld [vmem:[%s2762_s5] sm:$0xff] (!%p1866_p0)   ;;  %s2299_s11 = smov (!%p1866_p0), 120   ;;  %s2300_s16 = smov (!%p1866_p0), 112  }
  0x2e   : > { %1962 = vmatpush3.bf16.msra.mxu0 (!%p1866_p0), %v2159_v10  ;;  %1970 = vmatpush3.bf16.msra.mxu1 (!%p1866_p0), %v2160_v11  ;;  %s2301_s21 = smov (!%p1866_p0), 104   ;;  %s2302_s28 = smov (!%p1866_p0), 8  }
  0x2f   : > { %1975 = vmatprep.subr.bf16.mxu0 %v2297_v9  ;;  %1983 = vmatprep.subr.bf16.mxu1 %v2297_v9  ;;  %s2303_s18 = smov 16   ;;  %s2304_s19 = smov 24  }
  0x30   : > { %s2811_s9 = sld [smem:[#allocation21_spill]]  ;;  %s2814_s29 = sld [smem:[#allocation22_spill]] }
  0x31   : > { %s2815_s8 = sld [smem:[#allocation23_spill]] }
  0xb9   : > { %v632_v2 = vpop.xlane.xlu0 %631 }
  0xba   : > { %v634_v3 = vmul.f32 0.03125, %v632_v2 }
  0xbc   : > { %v635_v4 = vsub.f32 %v2499_v0, %v634_v3 }
  0xbe   : > { %v636_v5 = vmul.f32 %v635_v4, %v635_v4 }
  0xc0   : > { %v637_v6 = vsel %vm629_vm0, %v636_v5, 0.0 }
  0xc1   : > { %638 = vadd.xlane.f32.xlu0 %v637_v6 }
 0x14e   : > { %v639_v12 = vpop.xlane.xlu0 %638 }
 0x14f   : > { %v640_v13 = vmul.f32 0.03125, %v639_v12 }
 0x151   : > { %v641_v14 = vadd.f32 1e-05, %v640_v13 }
 0x153   : > { %2167 = vrsqrt.f32 %v641_v14 }
 0x15d   : > { %v2168_v15 = vpop.eup %2167 }
 0x15e   : > { %v643_v17 = vmul.f32 %v2168_v15, %v635_v4 }
 0x160   : > { %v650_v19 = vmul.f32 %v1867_v16, %v643_v17 }
 0x162   : > { %v657_v20 = vadd.f32 %v1868_v18, %v650_v19 }
 0x164   : > { %v658_v22 = vpack.c.bf16 %v657_v20, %v657_v20 }
 0x166   : > { %1964 = vmatmul.mubr.msk.bf16.vlgmr.msra.gmra.mrb[0].mxu0 %vm629_vm0, %v658_v22  ;;  %1972 = vmatmul.mubr.msk.bf16.vlgmr.msra.gmra.mrb[0].mxu1 %vm629_vm0, %v658_v22 }
 0x167   : > { %1976 = vmatpush3.bf16.msra.mxu0 %v2161_v21  ;;  %1979 = vmatprep.mubr.msk.bf16.mxu0 %vm2298_vm1, %v2297_v9 }
 0x168   : > { %1977 = vmatprep.subr.bf16.mxu0 %v2297_v9  ;;  %1985 = vmatprep.mubr.msk.bf16.mxu1 %vm2298_vm1, %v2297_v9 }
 0x16b   : > { %1978 = vmatpush3.bf16.msra.mxu0 %v2162_v23 }
 0x16c   : > { %1989 = vmatprep.subr.bf16.mxu0 %v2297_v9 }
 0x16e   : > { %1980 = vmatmul.mubr.msk.bf16.vlgmr.msra.gmra.mrb[4].mxu0 %vm629_vm0, %v658_v22 }
 0x16f   : > { %1991 = vmatprep.mubr.msk.bf16.mxu0 %vm2298_vm1, %v2297_v9 }
 0x239   : > { %v708_v24 = vpop.f32.mrb[0].mxu0  ;;  %v760_v25 = vpop.f32.mrb[0].mxu1 }
 0x23a   : > { %833 = vrot.lane.b32.xlu1 %v760_v25, %s2299_s11  ;;  %v1973_v26 = vpop.f32.mrb[1].mxu1  ;;  %819 = vrot.lane.b32.xlu0 %v708_v24, %s2299_s11  ;;  %v1965_v27 = vpop.f32.mrb[1].mxu0  ;;  %v842_v28 = vpack.c.bf16 %v760_v25, %v760_v25  ;;  %v828_v35 = vpack.c.bf16 %v708_v24, %v708_v24 }
 0x23b   : > { %v711_v29 = vpop.f32.mrb[2].mxu0  ;;  %v763_v30 = vpop.f32.mrb[2].mxu1 }
 0x23c   : > { %v1966_v31 = vpop.f32.mrb[3].mxu0  ;;  %v1974_v32 = vpop.f32.mrb[3].mxu1  ;;  %v865_v33 = vsel %vm860_vm2, %v842_v28, 0 }
 0x23d   : > { %1984 = vmatpush3.bf16.xpose.msra.mxu1 %v865_v33 }
 0x23e   : > { %836 = vrot.lane.b32.xlu1 %v760_v25, %s2300_s16  ;;  %1995 = vmatprep.subr.bf16.mxu1 %v2297_v9 }
 0x241   : > { %v2555_v34 = vpop.f32.mrb[4].mxu0 }
 0x242   : > { %839 = vrot.lane.b32.xlu1 %v760_v25, %s2301_s21  ;;  %v1981_v36 = vpop.f32.mrb[5].mxu0  ;;  %v856_v50 = vpack.c.bf16 %v2555_v34, %v2555_v34 }
 0x243   : > { %v815_v37 = vpop.f32.mrb[6].mxu0 }
 0x244   : > { %v1982_v38 = vpop.f32.mrb[7].mxu0  ;;  %1986 = vmatmul.mubr.msk.bf16.vlgmr.msra.gmra.mrb[4].mxu1 %vm860_vm2, %v828_v35  ;;  %v1113_v53 = vsel %vm1111_vm3, %v856_v50, 0 }
 0x245   : > { %1997 = vmatprep.mubr.msk.bf16.mxu1 %vm2298_vm1, %v2297_v9 }
 0x246   : > { %822 = vrot.lane.b32.xlu1 %v708_v24, %s2300_s16 }
 0x24a   : > { %825 = vrot.lane.b32.xlu1 %v708_v24, %s2301_s21 }
 0x2ac   : > { %v834_v39 = vpop.permute.xlu1 %833  ;;  %v820_v44 = vpop.permute.xlu0 %819 }
 0x2ad   : > { %v843_v40 = vpack.c.bf16 %v834_v39, %v834_v39  ;;  %v829_v47 = vpack.c.bf16 %v820_v44, %v820_v44 }
 0x2af   : > { %v911_v41 = vsel %vm860_vm2, %v843_v40, 0 }
 0x2b0   : > { %v837_v42 = vpop.permute.xlu1 %836  ;;  %1990 = vmatpush3.bf16.xpose.msra.mxu0 %v911_v41 }
 0x2b1   : > { %v844_v43 = vpack.c.bf16 %v837_v42, %v837_v42  ;;  %2001 = vmatprep.subr.bf16.mxu0 %v2297_v9 }
 0x2b3   : > { %v957_v45 = vsel %vm860_vm2, %v844_v43, 0 }
 0x2b4   : > { %v840_v46 = vpop.permute.xlu1 %839  ;;  %1996 = vmatpush3.bf16.xpose.msra.mxu1 %v957_v45 }
 0x2b5   : > { %v845_v48 = vpack.c.bf16 %v840_v46, %v840_v46  ;;  %2007 = vmatprep.subr.bf16.mxu1 %v2297_v9 }
 0x2b7   : > { %v1003_v49 = vsel %vm860_vm2, %v845_v48, 0  ;;  %1992 = vmatmul.mubr.msk.bf16.vlgmr.msra.gmra.mrb[8].mxu0 %vm860_vm2, %v829_v47 }
 0x2b8   : > { %v823_v51 = vpop.permute.xlu1 %822  ;;  %2002 = vmatpush3.bf16.xpose.msra.mxu0 %v1003_v49  ;;  %2003 = vmatprep.mubr.msk.bf16.mxu0 %vm2298_vm1, %v2297_v9 }
 0x2b9   : > { %v830_v52 = vpack.c.bf16 %v823_v51, %v823_v51  ;;  %2013 = vmatprep.subr.bf16.mxu0 %v2297_v9 }
 0x2bb   : > { %1998 = vmatmul.mubr.msk.bf16.vlgmr.msra.gmra.mrb[8].mxu1 %vm860_vm2, %v830_v52 }
 0x2bc   : > { %v826_v54 = vpop.permute.xlu1 %825  ;;  %2008 = vmatpush3.bf16.msra.mxu1 %v1113_v53  ;;  %2009 = vmatprep.mubr.msk.bf16.mxu1 %vm2298_vm1, %v2297_v9 }
 0x2bd   : > { %v831_v55 = vpack.c.bf16 %v826_v54, %v826_v54  ;;  %2019 = vmatprep.subr.bf16.mxu1 %v2297_v9 }
 0x2bf   : > { %2004 = vmatmul.mubr.msk.bf16.vlgmr.msra.gmra.mrb[12].mxu0 %vm860_vm2, %v831_v55 }
 0x2c0   : > { %2015 = vmatprep.mubr.msk.bf16.mxu0 %vm2298_vm1, %v2297_v9 }
 0x317   : > { %v901_v59 = vpop.f32.mrb[4].mxu1 }
 0x318   : > { %v1045_v60 = vmul.f32 0.35355338, %v901_v59  ;;  %v1987_v61 = vpop.f32.mrb[5].mxu1 }
 0x319   : > { %v904_v62 = vpop.f32.mrb[6].mxu1 }
 0x31a   : > { %v1988_v63 = vpop.f32.mrb[7].mxu1  ;;  %v1056_v1 = vsel %vm1053_vm4, %v1045_v60, -1e+30 }
 0x31b   : > { %v1060_v2 = vsel %vm860_vm2, %v1056_v1, -inf }
 0x31c   : > { %1061 = vmax.xlane.f32.xlu1 %v1060_v2 }
 0x38a   : > { %v947_v3 = vpop.f32.mrb[8].mxu0 }
 0x38b   : > { %v1046_v4 = vmul.f32 0.35355338, %v947_v3  ;;  %v1993_v5 = vpop.f32.mrb[9].mxu0 }
 0x38c   : > { %v950_v6 = vpop.f32.mrb[10].mxu0 }
 0x38d   : > { %v1994_v7 = vpop.f32.mrb[11].mxu0  ;;  %v1057_v8 = vsel %vm1053_vm4, %v1046_v4, -1e+30 }
 0x38e   : > { %v993_v10 = vpop.f32.mrb[8].mxu1  ;;  %v1063_v11 = vsel %vm860_vm2, %v1057_v8, -inf }
 0x38f   : > { %v1047_v12 = vmul.f32 0.35355338, %v993_v10  ;;  %v1999_v13 = vpop.f32.mrb[9].mxu1  ;;  %1064 = vmax.xlane.f32.xlu0 %v1063_v11 }
 0x390   : > { %v996_v14 = vpop.f32.mrb[10].mxu1  ;;  %v2163_v13 = vld [vmem:[%s2763_s6] sm:$0xff]  }
 0x391   : > { %v2000_v15 = vpop.f32.mrb[11].mxu1  ;;  %v1058_v16 = vsel %vm1053_vm4, %v1047_v12, -1e+30 }
 0x392   : > { %v1039_v17 = vpop.f32.mrb[12].mxu0  ;;  %v1066_v18 = vsel %vm860_vm2, %v1058_v16, -inf }
 0x393   : > { %v1048_v19 = vmul.f32 0.35355338, %v1039_v17  ;;  %1067 = vmax.xlane.f32.xlu1 %v1066_v18  ;;  %v2005_v20 = vpop.f32.mrb[13].mxu0 }
 0x394   : > { %v1042_v21 = vpop.f32.mrb[14].mxu0 }
 0x395   : > { %v2006_v22 = vpop.f32.mrb[15].mxu0  ;;  %v1059_v23 = vsel %vm1053_vm4, %v1048_v19, -1e+30 }
 0x396   : > { %v1069_v24 = vsel %vm860_vm2, %v1059_v23, -inf  ;;  %v2164_v22 = vld [vmem:[%s2763_s6 + $0x8] sm:$0xff]  }
 0x397   : > { %1070 = vmax.xlane.f32.xlu1 %v1069_v24 }
 0x3a9   : > { %v1062_v25 = vpop.xlane.xlu1 %1061 }
 0x3aa   : > { %v1072_v26 = vsub.f32 %v1056_v1, %v1062_v25 }
 0x3ac   : > { %v1076_v27 = vmul.f32 1.442695, %v1072_v26 }
 0x3ae   : > { %2169 = vpow2.f32 %v1076_v27 }
 0x3b8   : > { %v2170_v28 = vpop.eup %2169 }
 0x3b9   : > { %v1084_v29 = vsel %vm860_vm2, %v2170_v28, 0.0 }
 0x3ba   : > { %1085 = vadd.xlane.f32.xlu0 %v1084_v29 }
 0x41c   : > { %v1065_v30 = vpop.xlane.xlu0 %1064 }
 0x41d   : > { %v1073_v31 = vsub.f32 %v1057_v8, %v1065_v30 }
 0x41f   : > { %v1078_v32 = vmul.f32 1.442695, %v1073_v31 }
 0x420   : > { %v1068_v33 = vpop.xlane.xlu1 %1067 }
 0x421   : > { %2171 = vpow2.f32 %v1078_v32  ;;  %v1074_v35 = vsub.f32 %v1058_v16, %v1068_v33 }
 0x423   : > { %v1080_v36 = vmul.f32 1.442695, %v1074_v35  ;;  %v1886_v35 = vld [vmem:[%s2811_s9] ss:$0 sm:$0xff] }
 0x424   : > { %v1071_v42 = vpop.xlane.xlu1 %1070 }
 0x425   : > { %2173 = vpow2.f32 %v1080_v36  ;;  %v1075_v43 = vsub.f32 %v1059_v23, %v1071_v42 }
 0x427   : > { %v1082_v44 = vmul.f32 1.442695, %v1075_v43 }
 0x42b   : > { %v2172_v37 = vpop.eup %2171 }
 0x42c   : > { %v1087_v38 = vsel %vm860_vm2, %v2172_v37, 0.0 }
 0x42d   : > { %1088 = vadd.xlane.f32.xlu1 %v1087_v38 }
 0x42f   : > { %v2174_v39 = vpop.eup %2173 }
 0x430   : > { %v1090_v40 = vsel %vm860_vm2, %v2174_v39, 0.0 }
 0x431   : > { %1091 = vadd.xlane.f32.xlu0 %v1090_v40 }
 0x43e   : > { %850 = vrot.lane.b32.xlu1 %v2555_v34, %s2300_s16  ;;  %s2816_s16 = sld [smem:[#allocation25_spill]] }
 0x447   : > { %847 = vrot.lane.b32.xlu0 %v2555_v34, %s2299_s11  ;;  %v1086_v41 = vpop.xlane.xlu0 %1085 }
 0x448   : > { %2175 = vrcp.f32 %v1086_v41 }
 0x449   : > { %2177 = vpow2.f32 %v1082_v44 }
 0x452   : > { %v2176_v45 = vpop.eup %2175 }
 0x453   : > { %v1100_v46 = vmul.f32 %v2176_v45, %v2170_v28  ;;  %v2178_v48 = vpop.eup %2177 }
 0x454   : > { %v1093_v49 = vsel %vm860_vm2, %v2178_v48, 0.0 }
 0x455   : > { %v1104_v47 = vpack.c.bf16 %v1100_v46, %v1100_v46 }
 0x457   : > { %2010 = vmatmul.mubr.msk.bf16.vlgmr.msra.gmra.mrb[12].mxu1 %vm860_vm2, %v1104_v47 }
 0x458   : > { %2021 = vmatprep.mubr.msk.bf16.mxu1 %vm2298_vm1, %v2297_v9 }
 0x462   : > { %1094 = vadd.xlane.f32.xlu1 %v1093_v49 }
 0x473   : > { %853 = vrot.lane.b32.xlu1 %v2555_v34, %s2301_s21  ;;  %s2812_s21 = sld [smem:[#allocation24_spill]] }
 0x4ba   : > { %v1089_v50 = vpop.xlane.xlu1 %1088 }
 0x4bb   : > { %2179 = vrcp.f32 %v1089_v50 }
 0x4be   : > { %v1092_v51 = vpop.xlane.xlu0 %1091  ;;  %v851_v52 = vpop.permute.xlu1 %850 }
 0x4bf   : > { %2181 = vrcp.f32 %v1092_v51  ;;  %v858_v53 = vpack.c.bf16 %v851_v52, %v851_v52 }
 0x4c1   : > { %v1205_v54 = vsel %vm1111_vm3, %v858_v53, 0  ;;  %v1890_v53 = vld [vmem:[%s2814_s29] ss:$0 sm:$0xff] }
 0x4c2   : > { %v848_v55 = vpop.permute.xlu0 %847  ;;  %2020 = vmatpush3.bf16.msra.mxu1 %v1205_v54 }
 0x4c3   : > { %v857_v56 = vpack.c.bf16 %v848_v55, %v848_v55  ;;  %2031 = vmatprep.subr.bf16.mxu1 %v2297_v9  ;;  %v1891_v55 = vld [vmem:[%s2815_s8] ss:$0 sm:$0xff] }
 0x4c5   : > { %v2180_v57 = vpop.eup %2179  ;;  %v1159_v59 = vsel %vm1111_vm3, %v857_v56, 0 }
 0x4c6   : > { %v1101_v60 = vmul.f32 %v2180_v57, %v2172_v37  ;;  %2014 = vmatpush3.bf16.msra.mxu0 %v1159_v59 }
 0x4c7   : > { %2025 = vmatprep.subr.bf16.mxu0 %v2297_v9 }
 0x4c8   : > { %v1105_v34 = vpack.c.bf16 %v1101_v60, %v1101_v60 }
 0x4c9   : > { %v2182_v61 = vpop.eup %2181 }
 0x4ca   : > { %v1102_v62 = vmul.f32 %v2182_v61, %v2174_v39  ;;  %2016 = vmatmul.mubr.msk.bf16.vlgmr.msra.gmra.mrb[16].mxu0 %vm860_vm2, %v1105_v34 }
 0x4cb   : > { %2027 = vmatprep.mubr.msk.bf16.mxu0 %vm2298_vm1, %v2297_v9 }
 0x4cc   : > { %v1106_v63 = vpack.c.bf16 %v1102_v62, %v1102_v62 }
 0x4ce   : > { %2022 = vmatmul.mubr.msk.bf16.vlgmr.msra.gmra.mrb[16].mxu1 %vm860_vm2, %v1106_v63 }
 0x4cf   : > { %2035 = vmatprep.mubr.msk.bf16.mxu1 %vm2298_vm1, %v2297_v9  ;;  %2032 = vmatpush3.bf16.msra.mxu1 %v2163_v13 }
 0x4d0   : > { %2033 = vmatprep.subr.bf16.mxu1 %v2297_v9 }
 0x4d3   : > { %2034 = vmatpush3.bf16.msra.mxu1 %v2164_v22 }
 0x4ef   : > { %v1095_v1 = vpop.xlane.xlu1 %1094 }
 0x4f0   : > { %2183 = vrcp.f32 %v1095_v1 }
 0x4f3   : > { %v854_v2 = vpop.permute.xlu1 %853 }
 0x4f4   : > { %v859_v3 = vpack.c.bf16 %v854_v2, %v854_v2 }
 0x4f6   : > { %v1251_v4 = vsel %vm1111_vm3, %v859_v3, 0 }
 0x4f7   : > { %2026 = vmatpush3.bf16.msra.mxu0 %v1251_v4 }
 0x4f8   : > { %2039 = vmatprep.subr.bf16.mxu0 %v2297_v9 }
 0x4fa   : > { %v2184_v5 = vpop.eup %2183 }
 0x4fb   : > { %v1103_v6 = vmul.f32 %v2184_v5, %v2178_v48  ;;  %v2165_v48 = vld [vmem:[%s2812_s21] sm:$0xff]  }
 0x4fd   : > { %v1107_v7 = vpack.c.bf16 %v1103_v6, %v1103_v6 }
 0x4ff   : > { %2028 = vmatmul.mubr.msk.bf16.vlgmr.msra.gmra.mrb[20].mxu0 %vm860_vm2, %v1107_v7 }
 0x500   : > { %2043 = vmatprep.mubr.msk.bf16.mxu0 %vm2298_vm1, %v2297_v9  ;;  %2040 = vmatpush3.bf16.msra.mxu0 %v2165_v48 }
 0x501   : > { %2041 = vmatprep.subr.bf16.mxu0 %v2297_v9  ;;  %v1892_v9 = vld [vmem:[%s2816_s16] ss:$0 sm:$0xff] }
 0x52a   : > { %v1149_v8 = vpop.f32.mrb[12].mxu1 }
 0x52b   : > { %v2011_v10 = vpop.f32.mrb[13].mxu1 }
 0x52c   : > { %v1152_v11 = vpop.f32.mrb[14].mxu1 }
 0x52d   : > { %v2012_v12 = vpop.f32.mrb[15].mxu1 }
 0x59d   : > { %v1195_v14 = vpop.f32.mrb[16].mxu0 }
 0x59e   : > { %1294 = vrot.lane.b32.xlu0 %v1195_v14, %s2302_s28  ;;  %v2017_v15 = vpop.f32.mrb[17].mxu0 }
 0x59f   : > { %v1198_v16 = vpop.f32.mrb[18].mxu0 }
 0x5a0   : > { %v2018_v17 = vpop.f32.mrb[19].mxu0 }
 0x5a1   : > { %v1241_v18 = vpop.f32.mrb[16].mxu1 }
 0x5a2   : > { %1298 = vrot.lane.b32.xlu1 %v1241_v18, %s2303_s18  ;;  %v2023_v19 = vpop.f32.mrb[17].mxu1  ;;  %s2813_s18 = smov %s2812_s21 }
 0x5a3   : > { %v1244_v20 = vpop.f32.mrb[18].mxu1 }
 0x5a4   : > { %v2024_v21 = vpop.f32.mrb[19].mxu1 }
 0x5d2   : > { %v1287_v23 = vpop.f32.mrb[20].mxu0 }
 0x5d3   : > { %1302 = vrot.lane.b32.xlu0 %v1287_v23, %s2304_s19  ;;  %v2029_v24 = vpop.f32.mrb[21].mxu0 }
 0x5d4   : > { %v1290_v25 = vpop.f32.mrb[22].mxu0 }
 0x5d5   : > { %v2030_v26 = vpop.f32.mrb[23].mxu0 }
 0x610   : > { %v1295_v27 = vpop.permute.xlu0 %1294 }
 0x611   : > { %v1305_v29 = vsel %vm860_vm2, %v1149_v8, %v1295_v27 }
 0x614   : > { %v1299_v28 = vpop.permute.xlu1 %1298 }
 0x615   : > { %v1307_v30 = vsel %vm1306_vm5, %v1305_v29, %v1299_v28 }
 0x645   : > { %v1303_v31 = vpop.permute.xlu0 %1302 }
 0x646   : > { %v1309_v32 = vsel %vm1308_vm6, %v1307_v30, %v1303_v31 }
 0x647   : > { %v1310_v33 = vpack.c.bf16 %v1309_v32, %v1309_v32 }
 0x649   : > { %2036 = vmatmul.mubr.msk.bf16.vlgmr.msra.gmra.mrb[20].mxu1 %vm629_vm0, %v1310_v33  ;;  %v2305_v33 = vmov 0  }
 0x71c   : > { %v1366_v36 = vpop.f32.mrb[20].mxu1 }
 0x71d   : > { %v1367_v37 = vadd.f32 %v1886_v35, %v1366_v36  ;;  %v2037_v38 = vpop.f32.mrb[21].mxu1 }
 0x71e   : > { %v1369_v39 = vpop.f32.mrb[22].mxu1 }
 0x71f   : > { %v1372_v40 = vadd.f32 %v1367_v37, %v2499_v0  ;;  %v2038_v41 = vpop.f32.mrb[23].mxu1  ;;  %v2166_v0 = vld [vmem:[%s2813_s18 + $0x8] sm:$0xff]  }
 0x720   : > { %2042 = vmatpush3.bf16.msra.mxu0 %v2166_v0 }
 0x721   : > { %1524 = vst.msk [vmem:[#allocation2] sm:$0xff] %vm629_vm0, %v1372_v40  ;;  %v1373_v42 = vsel %vm629_vm0, %v1372_v40, 0.0 }
 0x722   : > { %1374 = vadd.xlane.f32.xlu1 %v1373_v42 }
 0x7af   : > { %v1375_v43 = vpop.xlane.xlu1 %1374 }
 0x7b0   : > { %v1376_v44 = vmul.f32 0.03125, %v1375_v43 }
 0x7b2   : > { %v1377_v45 = vsub.f32 %v1372_v40, %v1376_v44 }
 0x7b4   : > { %v1378_v46 = vmul.f32 %v1377_v45, %v1377_v45 }
 0x7b6   : > { %v1379_v47 = vsel %vm629_vm0, %v1378_v46, 0.0 }
 0x7b7   : > { %1380 = vadd.xlane.f32.xlu0 %v1379_v47 }
 0x844   : > { %v1381_v49 = vpop.xlane.xlu0 %1380 }
 0x845   : > { %v1382_v50 = vmul.f32 0.03125, %v1381_v49 }
 0x847   : > { %v1383_v51 = vadd.f32 1e-05, %v1382_v50 }
 0x849   : > { %2185 = vrsqrt.f32 %v1383_v51 }
 0x853   : > { %v2186_v52 = vpop.eup %2185 }
 0x854   : > { %v1385_v54 = vmul.f32 %v2186_v52, %v1377_v45 }
 0x856   : > { %v1392_v56 = vmul.f32 %v1890_v53, %v1385_v54 }
 0x858   : > { %v1399_v57 = vadd.f32 %v1891_v55, %v1392_v56 }
 0x85a   : > { %v1400_v59 = vpack.c.bf16 %v1399_v57, %v1399_v57 }
 0x85c   : > { %2044 = vmatmul.mubr.msk.bf16.vlgmr.msra.gmra.mrb[24].mxu0 %vm629_vm0, %v1400_v59  ;;  %1526 = vst.msk [vmem:[#allocation3] sm:$0xf] %vm1525_vm7, %v1400_v59 }
 0x92f   : > { %v1456_v60 = vpop.f32.mrb[24].mxu0 }
 0x930   : > { %v1457_v34 = vadd.f32 %v1892_v9, %v1456_v60  ;;  %v2045_v61 = vpop.f32.mrb[25].mxu0 }
 0x931   : > { %v1459_v62 = vpop.f32.mrb[26].mxu0 }
 0x932   : > { %v2046_v63 = vpop.f32.mrb[27].mxu0  ;;  %v1463_v1 = vsel %vm1462_vm8, %v1457_v34, -inf }
 0x933   : > { %1464 = vmax.xlane.f32.xlu0 %v1463_v1 }
 0x9c0   : > { %v1465_v2 = vpop.xlane.xlu0 %1464 }
 0x9c1   : > { %vm1466_vm9 = vcmp.ge.f32.partialorder %v1457_v34, %v1465_v2 }
 0x9c2   : > { %v1467_v3 = vsel %vm1466_vm9, %v2582_v58, 5 }
 0x9c3   : > { %v1468_v4 = vsel %vm1462_vm8, %v1467_v3, 2147483647 }
 0x9c4   : > { %v1470_v5 = vshra.s32 %v1468_v4, 16  ;;  %v1469_v7 = vand.u32 65535, %v1468_v4 }
 0x9c6   : > { %v1472_v6 = vcvt.s32.f32 %v1470_v5  ;;  %v1471_v10 = vcvt.s32.f32 %v1469_v7 }
 0x9c8   : > { %1473 = vmin.xlane.f32.xlu1 %v1472_v6 }
 0xa55   : > { %v1474_v8 = vpop.xlane.xlu1 %1473 }
 0xa56   : > { %vm1475_vm10 = vcmp.eq.f32.partialorder %v1472_v6, %v1474_v8  ;;  %v1480_v12 = vcvt.f32.s32 %v1474_v8 }
 0xa57   : > { %v1476_v11 = vsel %vm1475_vm10, %v1471_v10, inf }
 0xa58   : > { %1477 = vmin.xlane.f32.xlu0 %v1476_v11  ;;  %v1481_v14 = vshll.u32 %v1480_v12, 16 }
 0xae5   : > { %v1478_v13 = vpop.xlane.xlu0 %1477 }
 0xae6   : > { %v1479_v15 = vcvt.f32.s32 %v1478_v13 }
 0xae8   : > { %v1482_v16 = vadd.s32 %v1481_v14, %v1479_v15 }
 0xaea   : > { %vm1483_vm11 = vcmp.eq.s32.totalorder %v2582_v58, %v1482_v16 }
 0xaeb   : > { %v1486_v17 = vsel %vm1483_vm11, -1e+30, %v1457_v34  ;;  %v1484_v35 = vsel %vm1483_vm11, 1, %v2305_v33 }
 0xaec   : > { %v1487_v18 = vsel %vm1462_vm8, %v1486_v17, -inf  ;;  %v1485_v36 = vsel %vm1483_vm11, %v1484_v35, 0 }
 0xaed   : > { %1488 = vmax.xlane.f32.xlu1 %v1487_v18 }
 0xb7a   : > { %v1489_v19 = vpop.xlane.xlu1 %1488 }
 0xb7b   : > { %vm1490_vm12 = vcmp.ge.f32.partialorder %v1486_v17, %v1489_v19 }
 0xb7c   : > { %v1491_v20 = vsel %vm1490_vm12, %v2582_v58, 5 }
 0xb7d   : > { %v1492_v21 = vsel %vm1462_vm8, %v1491_v20, 2147483647 }
 0xb7e   : > { %v1494_v22 = vshra.s32 %v1492_v21, 16  ;;  %v1493_v24 = vand.u32 65535, %v1492_v21 }
 0xb80   : > { %v1496_v23 = vcvt.s32.f32 %v1494_v22  ;;  %v1495_v26 = vcvt.s32.f32 %v1493_v24 }
 0xb82   : > { %1497 = vmin.xlane.f32.xlu0 %v1496_v23 }
 0xc0f   : > { %v1498_v25 = vpop.xlane.xlu0 %1497 }
 0xc10   : > { %vm1499_vm13 = vcmp.eq.f32.partialorder %v1496_v23, %v1498_v25  ;;  %v1504_v28 = vcvt.f32.s32 %v1498_v25 }
 0xc11   : > { %v1500_v27 = vsel %vm1499_vm13, %v1495_v26, inf }
 0xc12   : > { %1501 = vmin.xlane.f32.xlu1 %v1500_v27  ;;  %v1505_v30 = vshll.u32 %v1504_v28, 16 }
 0xc9f   : > { %v1502_v29 = vpop.xlane.xlu1 %1501 }
 0xca0   : > { %v1503_v31 = vcvt.f32.s32 %v1502_v29 }
 0xca2   : > { %v1506_v32 = vadd.s32 %v1505_v30, %v1503_v31 }
 0xca4   : > { %vm1507_vm14 = vcmp.eq.s32.totalorder %v2582_v58, %v1506_v32 }
 0xca5   : > { %v1508_v37 = vsel %vm1507_vm14, 1, %v2305_v33 }
 0xca6   : > { %vm1509_vm15 = vcmp.gt.s32.totalorder %v1485_v36, %v1508_v37 }
 0xca7   : > { %v1510_v38 = vsel %vm1509_vm15, %v1485_v36, %v1508_v37 }
 0xca8   : > { %vm1511_vm0 = vcmp.gt.s32.totalorder %v1510_v38, 0 }
 0xca9   : > { %v1512_v39 = vsel %vm1511_vm0, %v1457_v34, -1e+30 }
 0xcaa   : > { %v1513_v40 = vsel %vm1462_vm8, %v1512_v39, -inf }
 0xcab   : > { %1514 = vmax.xlane.f32.xlu0 %v1513_v40 }
 0xd38   : > { %v1515_v41 = vpop.xlane.xlu0 %1514 }
 0xd39   : > { %v1516_v42 = vsub.f32 %v1512_v39, %v1515_v41 }
 0xd3b   : > { %v1517_v43 = vmul.f32 1.442695, %v1516_v42 }
 0xd3d   : > { %2187 = vpow2.f32 %v1517_v43 }
 0xd47   : > { %v2188_v44 = vpop.eup %2187 }
 0xd48   : > { %v1519_v45 = vsel %vm1462_vm8, %v2188_v44, 0.0 }
 0xd49   : > { %1520 = vadd.xlane.f32.xlu1 %v1519_v45 }
 0xdd6   : > { %v1521_v46 = vpop.xlane.xlu1 %1520 }
 0xdd7   : > { %2189 = vrcp.f32 %v1521_v46 }
 0xde1   : > { %v2190_v58 = vpop.eup %2189 }
 0xde2   : > { %v1523_v47 = vmul.f32 %v2190_v58, %v2188_v44 }
 0xde4   : > { %1527 = vst.msk [vmem:[#allocation4] sm:$0xff] %vm1462_vm8, %v1523_v47 }
 0xde5 PF: > { %v2191_v48 = vld [vmem:[%s2481_s30] sm:$0xff]   ;;  %v2306_v0 = vmov 0.0   ;;  %v2192_v49 = vld [vmem:[%s2481_s30 + $0x8] sm:$0xff]   ;;  %vm2307_vm1 = vmmov 0   ;;  %vm1569_vm2 = vcmask 261120   ;;  %v2195_v53 = vld [vmem:[%s2495_s27 + $0x10] sm:$0xff]   ;;  %v1709_v9 = vlaneseq }
 0xde6   : > { %2047 = vmatprep.subr.bf16.mxu0 %v2306_v0  ;;  %2055 = vmatprep.subr.bf16.mxu1 %v2306_v0  ;;  %v2193_v50 = vld [vmem:[%s2495_s27] sm:$0xff]   ;;  %v2194_v51 = vld [vmem:[%s2495_s27 + $0x8] sm:$0xff]   ;;  %v2196_v54 = vld [vmem:[%s2495_s27 + $0x18] sm:$0xff]   ;;  %v1711_v60 = vstv %s2279_s24  ;;  %vm1715_vm3 = vcmask 39936   ;;  %p1909_p1 = scmp.ne.s32.totalorder %s2279_s24, 3 }
 0xde7   : > { %2048 = vmatpush3.bf16.msra.mxu0 %v2191_v48  ;;  %2051 = vmatprep.mubr.msk.bf16.mxu0 %vm2307_vm1, %v2306_v0  ;;  %v1528_v52 = vld [vmem:[#allocation3] sm:$0xf]  ;;  %v2197_v55 = vld [vmem:[%s2495_s27 + $0x20] sm:$0xff]   ;;  %v2199_v57 = vld [vmem:[%s2495_s27 + $0x30] sm:$0xff]   ;;  %v1710_v34 = vand.u32 127, %v1709_v9 }
 0xde8   : > { %2049 = vmatprep.subr.bf16.mxu0 %v2306_v0  ;;  %2071 = vmatprep.mubr.msk.bf16.mxu1 %vm2307_vm1, %v2306_v0  ;;  %v2198_v56 = vld [vmem:[%s2495_s27 + $0x28] sm:$0xff]   ;;  %v2200_v59 = vld [vmem:[%s2495_s27 + $0x38] sm:$0xff]   ;;  %v1896_v1 = vld [vmem:[%s588_s25] ss:$0 sm:$0xff] }
 0xde9   : > { %2056 = vmatpush3.bf16.msra.mxu1 %v2193_v50  ;;  %vm1712_vm4 = vcmp.eq.s32.totalorder %v1710_v34, %v1711_v60  ;;  %v1900_v10 = vld [vmem:[%s596_s10] ss:$0 sm:$0xff] }
 0xdea   : > { %2057 = vmatprep.subr.bf16.mxu1 %v2306_v0  ;;  %v1719_v16 = vld [vmem:[#allocation2] sm:$0xff] }
 0xdeb   : > { %2050 = vmatpush3.bf16.msra.mxu0 %v2192_v49  ;;  %v1713_v61 = vld [vmem:[#allocation4] sm:$0xff] }
 0xdec   : > { %v1714_v62 = vsel %vm1712_vm4, %v1713_v61, 0.0 }
 0xded   : > { %2058 = vmatpush3.bf16.msra.mxu1 %v2194_v51  ;;  %v1716_v63 = vsel %vm1715_vm3, %v1714_v62, 0.0 }
 0xdee   : > { %2052 = vmatmul.mubr.msk.bf16.vlgmr.msra.gmra.mrb[0].mxu0 %vm1569_vm2, %v1528_v52  ;;  %2059 = vmatprep.subr.bf16.mxu1 %v2306_v0 }
 0xdef   : > { %1717 = vadd.xlane.f32.xlu0 %v1716_v63 }
 0xdf1   : > { %2060 = vmatpush3.bf16.msra.mxu1 %v2195_v53 }
 0xdf2   : > { %2061 = vmatprep.subr.bf16.mxu1 %v2306_v0 }
 0xdf5   : > { %2062 = vmatpush3.bf16.msra.mxu1 %v2196_v54 }
 0xdf6   : > { %2063 = vmatprep.subr.bf16.mxu1 %v2306_v0 }
 0xdf9   : > { %2064 = vmatpush3.bf16.msra.mxu1 %v2197_v55 }
 0xdfa   : > { %2065 = vmatprep.subr.bf16.mxu1 %v2306_v0 }
 0xdfd   : > { %2066 = vmatpush3.bf16.msra.mxu1 %v2198_v56 }
 0xdfe   : > { %2067 = vmatprep.subr.bf16.mxu1 %v2306_v0 }
 0xe01   : > { %2068 = vmatpush3.bf16.msra.mxu1 %v2199_v57 }
 0xe02   : > { %2069 = vmatprep.subr.bf16.mxu1 %v2306_v0 }
 0xe05   : > { %2070 = vmatpush3.bf16.msra.mxu1 %v2200_v59 }
 0xe7c   : > { %v1718_v12 = vpop.xlane.xlu0 %1717 }
 0xec1   : > { %v1607_v2 = vpop.f32.mrb[0].mxu0 }
 0xec2   : > { %v1608_v3 = vadd.f32 %v1896_v1, %v1607_v2  ;;  %v2053_v4 = vpop.f32.mrb[1].mxu0 }
 0xec3   : > { %v1610_v5 = vpop.f32.mrb[2].mxu0 }
 0xec4   : > { %v1613_v6 = vmax.f32 %v1608_v3, 0.0  ;;  %v2054_v7 = vpop.f32.mrb[3].mxu0 }
 0xec6   : > { %v1614_v8 = vpack.c.bf16 %v1613_v6, %v1613_v6 }
 0xec8   : > { %2072 = vmatmul.mubr.bf16.vlgmr.msra.gmra.mrb[0].mxu1 %v1614_v8 }
 0xf9b   : > { %v1703_v11 = vpop.f32.mrb[0].mxu1 }
 0xf9c   : > { %v1704_v13 = vadd.f32 %v1900_v10, %v1703_v11  ;;  %v2073_v14 = vpop.f32.mrb[1].mxu1  ;;  %1726 = sbr.rel (%p1909_p1) target bundleno = 4011 (0xfab), region = 92 }
 0xf9d   : > { %v1706_v15 = vpop.f32.mrb[2].mxu1 }
 0xf9e   : > { %v1720_v17 = vmul.f32 %v1718_v12, %v1704_v13  ;;  %v2074_v18 = vpop.f32.mrb[3].mxu1 }
 0xfa0   : > { %v1721_v19 = vadd.f32 %v1720_v17, %v1719_v16 }
 0xfa2   : > { %1722 = vst.msk [vmem:[#allocation2] sm:$0xff] %vm1569_vm2, %v1721_v19 }
 0xfa9   : > { %v1727_v20 = vld [vmem:[#allocation2] sm:$0xff] }
 0xfaa   : > { %1728 = vst.msk [vmem:[%s576_s0] sm:$0xff] %vm1569_vm2, %v1727_v20 }
 0xfab PF: > { %s2817_s10 = sld [smem:[#allocation11_spill]]  ;;  %s2820_s29 = sld [smem:[#allocation26_spill]] }
 0xfac   : > { %s2818_s25 = sld [smem:[#allocation9_spill]]  ;;  %s1743_s7 = sshll.u32 %s576_s0, 4  ;;  %s1744_s7 = int_to_ptr.vmem [resolvable:$true] %s1743_s7 }
 0xfad   : > { %s2201_s9 = scalar_lea.vmem %s1744_s7, 128  ;;  %s2308_s11 = smov [#allocation5]  }
 0xfae   : > { %p2202_p2 = scmp.ne.s32.totalorder %s1744_s7, %s2201_s9  ;;  %s2205_s16 = sshll.u32 %s2308_s11, 4  ;;  %s2206_s16 = int_to_ptr.vmem [resolvable:$false] %s2205_s16 }
 0xfaf   : > { %s2207_s30 = scalar_lea.vmem %s2206_s16, 256  ;;  %p2208_p6 = scmp.lt.s32.totalorder %s1744_s7, %s2206_s16 }
 0xfb0   : > { %p2203_p4 = pnand %p2202_p2, %p2443_p3  ;;  %p2209_p7 = scmp.lt.s32.totalorder %s2207_s30, %s2201_s9 }
 0xfb1   : > { %s1911_s23 = sshll.u32 %s2817_s10, 7 }
 0xfb2   : > { %s2706_s19 = scalar_lea.hbm %s2820_s29, %s1911_s23  ;;  %s2821_s24 = sand.u32 1, %s2818_s25  }
 0xfb3   : > { %s1730_s8 = scalar_lea.sflag [#allocation6], %s2821_s24  ;;  %p2204_p5 = pneg %p2203_p4 }
 0xfb4   : > { %p2210_p8 = por %p2209_p7, %p2208_p6 }
 0xfb6   : > { %p2211_p10 = pnand %p2210_p8, %p2204_p5 }
 0xfb8   : > { %2214 = shalt.err (!%p2211_p10)
}
 0xfb9   : > { %s2215_s26 = scalar_lea.hbm %s2706_s19, 128  ;;  %s2219_s27 = scalar_lea.hbm %s2820_s29, 256 }
 0xfba   : > { %p2216_p11 = scmp.ne.s32.totalorder %s2706_s19, %s2215_s26  ;;  %p2220_p0 = scmp.lt.u32.totalorder %s2706_s19, %s2820_s29 }
 0xfbb   : > { %p2221_p1 = scmp.lt.u32.totalorder %s2219_s27, %s2215_s26  ;;  %p2223_p4 = scmp.lt.u32.totalorder %s2215_s26, %s2706_s19 }
 0xfbc   : > { %p2217_p12 = pnand %p2216_p11, %p2443_p3 }
 0xfbd   : > { %p2222_p2 = por %p2221_p1, %p2220_p0 }
 0xfbe   : > { %p2218_p13 = pneg %p2217_p12 }
 0xfbf   : > { %p2224_p5 = por %p2223_p4, %p2222_p2 }
 0xfc1   : > { %p2225_p6 = pnand %p2224_p5, %p2218_p13 }
 0xfc3   : > { %2228 = shalt.err (!%p2225_p6)
}
 0xfc4   : > { %2075 = dma.vmem_to_hbm [thread:$0]  (%p2443_p3), %s1744_s7, 128, %s2706_s19, %s1730_s8  }
 0xfc5 PF: > { %s2822_s25 = sld [smem:[#allocation14_spill]]  ;;  %s2823_s23 = sld [smem:[#allocation8_spill]] }
 0xfcb   : > { %p2081_p7 = scmp.ge.s32.totalorder %s2822_s25, 2  ;;  %s1755_s20 = sand.u32 1, %s2823_s23  }
 0xfcc   : > { %s1756_s24 = scalar_lea.sflag [#allocation6], %s1755_s20 }
 0xfcd   : > { %p2078_p8 = pnand %p2081_p7, %p2453_p9 }
 0xfcf   : > { %2262 = dma.done.wait (!%p2078_p8), %s1756_s24, 128  }
 0xfd0   : > { %2264 = vsyncadd (!%p2078_p8), %s1756_s24, 4294967168  ;;  %s29_s28 = sadd.s32 1, %s2822_s25   ;;  %s2825_s21 = sld [smem:[#allocation9_spill]] }
 0xfd1   : > { %p26_p10 = scmp.ge.s32.totalorder %s29_s28, 10   ;;  %s2826_s22 = sld [smem:[#allocation10_spill]] }
 0xfd2   : > { %s2827_s23 = sld [smem:[#allocation19_spill]]  ;;  %s2828_s24 = sld [smem:[#allocation12_spill]] }
 0xfd3   : > { %s2829_s25 = sld [smem:[#allocation13_spill]]  ;;  %s2830_s26 = sld [smem:[#allocation15_spill]] }
 0xfd4   : > { %s2831_s27 = sld [smem:[#allocation17_spill]]  ;;  %28 = sbr.rel (!%p26_p10) target bundleno = 13 (0xd), region = 139 }
 0xfdb   :  { %1761 = vsyncpa [#allocation6], 1 }
 0xfdc   :  { %1763 = vsyncpa [#allocation6 + $0x1], 1 }

</bundles_post_ra>
